<compile_context>
chip_gen: v7x
topology: tpu7x:2x2x1
jax: 0.10.0
libtpu: 0.0.40
codegen_flags: <defaults>
</compile_context>

<pallas_src>
import jax
import jax.numpy as jnp
from jax import lax
from jax.experimental import pallas as pl
from jax.experimental.pallas import tpu as pltpu


# Above this sequence length the per-layer gate projection (T, Bs, 4H) is
# staged through a VMEM scratch and the recurrence uses a bounded unroll; at
# or below it the gates stay vreg-resident and the loop is fully unrolled so
# the LLO scheduler can overlap MXU/EUP/VPU work across timesteps.
_VREG_GX_T_MAX = 16


def _lstm_cell(g, c, H):
    """One LSTM cell from pre-activations g (Bs, 4H), gate order (i, f, o, g)."""
    sg = jax.nn.sigmoid(g[:, 0:3 * H])        # i | f | o in a single EUP pass
    i = sg[:, 0:H]
    f = sg[:, H:2 * H]
    o = sg[:, 2 * H:3 * H]
    gg = jnp.tanh(g[:, 3 * H:4 * H])
    c_new = f * c + i * gg
    h_new = o * jnp.tanh(c_new)
    return h_new, c_new


def _make_lstm_kernel(use_gx_scratch, unroll):
    """Grid: (batch_shard [parallel], layer [arbitrary/sequential])."""

    def kernel(gx0_ref, wih_ref, whh_ref, b_ref, h0_ref, c0_ref,
               h_out_ref, c_out_ref, *scratch):
        if use_gx_scratch:
            seq_ref, gx_ref = scratch
        else:
            (seq_ref,) = scratch
        l = pl.program_id(1)
        T, Bs, H = seq_ref.shape

        whh = whh_ref[0]                      # (H, 4H), pre-transposed

        def deep_gx():
            # Previous layer's outputs (already resident in VMEM) -> gate
            # pre-activations for all T in one MXU matmul.  Direct dot_general
            # on (T, Bs, H) x (H, 4H): no reshapes, no relayout copies.
            return lax.dot_general(
                seq_ref[...], wih_ref[0],
                dimension_numbers=(((2,), (0,)), ((), ())),
                preferred_element_type=jnp.float32) + b_ref[0]

        h = h0_ref[0]
        c = c0_ref[0]

        if not use_gx_scratch:
            # Small T: keep the gates vreg-resident.  Layer 0 reuses the
            # projection hoisted to the wrapper (bias already folded in).
            gx = lax.cond(l == 0, lambda: gx0_ref[...], deep_gx)
            # Trace-time unrolled loop -> static t -> static vreg slices.
            for t in range(T):
                g = gx[t] + jnp.dot(h, whh, preferred_element_type=jnp.float32)
                h, c = _lstm_cell(g, c, H)
                seq_ref[t] = h                # input sequence for next layer
            h_out_ref[0] = h
            c_out_ref[0] = c
        else:
            @pl.when(l == 0)
            def _():
                gx_ref[...] = gx0_ref[...]

            @pl.when(l != 0)
            def _():
                gx_ref[...] = deep_gx()

            def step(t, carry):
                h_t, c_t = carry
                g = gx_ref[t] + jnp.dot(h_t, whh,
                                        preferred_element_type=jnp.float32)
                h_new, c_new = _lstm_cell(g, c_t, H)
                seq_ref[t] = h_new
                return h_new, c_new

            h_fin, c_fin = lax.fori_loop(0, T, step, (h, c), unroll=unroll)
            h_out_ref[0] = h_fin
            c_out_ref[0] = c_fin

    return kernel


def _reorder_gates(w, axis):
    """(i, f, g, o) -> (i, f, o, g) along `axis` so i|f|o share one sigmoid."""
    i_, f_, g_, o_ = jnp.split(w, 4, axis=axis)
    return jnp.concatenate([i_, f_, o_, g_], axis=axis)


def encoder_forward(x, params, h0, c0, *, num_batch_shards=1):
    """x: (B, T, I) batch_first; returns (h, c), each (L, B, H) like nn.LSTM."""
    wih, whh, b = params
    L, fourH, _D = wih.shape
    H = fourH // 4
    B, T, I = x.shape

    assert B % num_batch_shards == 0
    Bs = B // num_batch_shards
    if num_batch_shards > 1:
        # Megacore (v7x) batch split needs tile-friendly shard sizes.
        assert Bs % 8 == 0, "batch sharding requires shard size multiple of 8"

    # ---- wrapper-side weight prep (gate reorder + transpose, once) ---------
    b_r = _reorder_gates(b, axis=2)                                  # (L,1,4H)
    whh_t = jnp.transpose(_reorder_gates(whh, axis=1), (0, 2, 1))    # (L,H,4H)
    # Deep-layer input weights (in_dim == H for layers >= 1); the layer-0 slot
    # is never read by the kernel (its projection is hoisted below).
    wih_t = jnp.transpose(_reorder_gates(wih[:, :, :H], axis=1), (0, 2, 1))

    # ---- hoisted layer-0 input projection (plain XLA, off the kernel path) -
    w0 = _reorder_gates(wih[0, :, :I], axis=0)                       # (4H, I)
    x_tm = jnp.transpose(x, (1, 0, 2))                               # (T,B,I)
    gx0 = jnp.einsum('tbi,gi->tbg', x_tm, w0,
                     preferred_element_type=jnp.float32) + b_r[0]    # (T,B,4H)

    use_gx_scratch = T > _VREG_GX_T_MAX
    unroll = True if not use_gx_scratch else min(8, T)

    scratch_shapes = [pltpu.VMEM((T, Bs, H), jnp.float32)]           # layer seq
    if use_gx_scratch:
        scratch_shapes.append(pltpu.VMEM((T, Bs, fourH), jnp.float32))

    # Explicit scoped-VMEM budget: BlockSpec inputs are double-buffered;
    # cap well under v7x's 64 MiB/TC while still raising v5e/v6e defaults.
    block_bytes = 4 * (2 * T * Bs * fourH            # gx0 block (x2 buffers)
                       + 2 * 2 * H * fourH           # W_ih^T + W_hh^T blocks
                       + 2 * fourH                   # bias
                       + 2 * 4 * Bs * H              # h0/c0/h_out/c_out
                       + T * Bs * H                  # seq scratch
                       + (T * Bs * fourH if use_gx_scratch else 0))
    vmem_limit = int(min(max(block_bytes + (1 << 20), 16 << 20), 48 << 20))

    h, c = pl.pallas_call(
        _make_lstm_kernel(use_gx_scratch, unroll),
        out_shape=(jax.ShapeDtypeStruct((L, B, H), jnp.float32),
                   jax.ShapeDtypeStruct((L, B, H), jnp.float32)),
        grid_spec=pltpu.PrefetchScalarGridSpec(
            num_scalar_prefetch=0,
            grid=(num_batch_shards, L),
            in_specs=[
                pl.BlockSpec((T, Bs, fourH), lambda s, l: (0, s, 0)),  # gx0
                pl.BlockSpec((1, H, fourH), lambda s, l: (l, 0, 0)),   # W_ih^T
                pl.BlockSpec((1, H, fourH), lambda s, l: (l, 0, 0)),   # W_hh^T
                pl.BlockSpec((1, 1, fourH), lambda s, l: (l, 0, 0)),   # bias
                pl.BlockSpec((1, Bs, H), lambda s, l: (l, s, 0)),      # h0
                pl.BlockSpec((1, Bs, H), lambda s, l: (l, s, 0)),      # c0
            ],
            out_specs=[
                pl.BlockSpec((1, Bs, H), lambda s, l: (l, s, 0)),      # h
                pl.BlockSpec((1, Bs, H), lambda s, l: (l, s, 0)),      # c
            ],
            scratch_shapes=scratch_shapes,
        ),
        compiler_params=pltpu.CompilerParams(
            dimension_semantics=("parallel", "arbitrary"),
            vmem_limit_bytes=vmem_limit),
    )(gx0, wih_t, whh_t, b_r, h0, c0)
    return h, c


def init_params(key, input_size, hidden_size, num_layers):
    """Deterministic PyTorch-style LSTM init: U(-1/sqrt(H), 1/sqrt(H)).

    Returns PyTorch-layout params: W_ih (L,4H,D) (zero-padded to D=max(I,H)),
    W_hh (L,4H,H), bias (L,1,4H), gate order (i,f,g,o).
    """
    D = max(input_size, hidden_size)
    bound = 1.0 / float(hidden_size) ** 0.5
    keys = jax.random.split(key, num_layers * 4)
    wih, whh, bias = [], [], []
    for l in range(num_layers):
        in_dim = input_size if l == 0 else hidden_size
        k0, k1, k2, k3 = keys[4 * l:4 * l + 4]
        w_ih = jax.random.uniform(k0, (4 * hidden_size, in_dim),
                                  minval=-bound, maxval=bound, dtype=jnp.float32)
        w_hh = jax.random.uniform(k1, (4 * hidden_size, hidden_size),
                                  minval=-bound, maxval=bound, dtype=jnp.float32)
        b_ih = jax.random.uniform(k2, (4 * hidden_size,),
                                  minval=-bound, maxval=bound, dtype=jnp.float32)
        b_hh = jax.random.uniform(k3, (4 * hidden_size,),
                                  minval=-bound, maxval=bound, dtype=jnp.float32)
        wih.append(jnp.pad(w_ih, ((0, 0), (0, D - in_dim))))
        whh.append(w_hh)
        bias.append((b_ih + b_hh)[None, :])
    return jnp.stack(wih), jnp.stack(whh), jnp.stack(bias)


def lstm_ref(x, wih, whh, b, h0, c0, input_size, hidden_size):
    """Pure-JAX reference with PyTorch LSTM semantics (correctness check)."""
    B, T, _ = x.shape
    L = wih.shape[0]
    H = hidden_size
    layer_in = x
    h_all, c_all = [], []
    for l in range(L):
        in_dim = input_size if l == 0 else H
        W_ih = wih[l][:, :in_dim]
        W_hh = whh[l]
        bl = b[l][0]
        h, c = h0[l], c0[l]
        outs = []
        for t in range(T):
            g = layer_in[:, t, :] @ W_ih.T + h @ W_hh.T + bl
            i = jax.nn.sigmoid(g[:, :H])
            f = jax.nn.sigmoid(g[:, H:2 * H])
            gg = jnp.tanh(g[:, 2 * H:3 * H])
            o = jax.nn.sigmoid(g[:, 3 * H:])
            c = f * c + i * gg
            h = o * jnp.tanh(c)
            outs.append(h)
        layer_in = jnp.stack(outs, axis=1)
        h_all.append(h)
        c_all.append(c)
    return jnp.stack(h_all), jnp.stack(c_all)


if __name__ == "__main__":
    # Small shapes consistent with Encoder(input_size, hidden_size, num_layers,
    # batch_size): B=2, T=8, input=16, hidden=32, layers=2.
    B, T, I, H, L = 2, 8, 16, 32, 2

    key = jax.random.PRNGKey(0)
    kx, kh, kc, kp = jax.random.split(key, 4)
    x = jax.random.normal(kx, (B, T, I), dtype=jnp.float32)
    # PyTorch forward draws h_0 / c_0 from randn each call; deterministic here.
    h0 = jax.random.normal(kh, (L, B, H), dtype=jnp.float32)
    c0 = jax.random.normal(kc, (L, B, H), dtype=jnp.float32)
    params = init_params(kp, I, H, L)

    h, c = encoder_forward(x, params, h0, c0, num_batch_shards=1)
    jax.block_until_ready((h, c))

    h_ref, c_ref = lstm_ref(x, *params, h0, c0, I, H)
    assert h.shape == (L, B, H) and c.shape == (L, B, H)
    assert jnp.allclose(h, h_ref, atol=1e-4, rtol=1e-4)
    assert jnp.allclose(c, c_ref, atol=1e-4, rtol=1e-4)
    print("KERNEL_OK")
</pallas_src>

<mosaic_0001>
module attributes {stable_mosaic.version = 11 : i64} {
  func.func @kernel(%arg0: i32, %arg1: i32, %arg2: memref<8x2x128xf32, #tpu.memory_space<vmem>>, %arg3: memref<1x32x128xf32, #tpu.memory_space<vmem>>, %arg4: memref<1x32x128xf32, #tpu.memory_space<vmem>>, %arg5: memref<1x1x128xf32, #tpu.memory_space<vmem>>, %arg6: memref<1x2x32xf32, #tpu.memory_space<vmem>>, %arg7: memref<1x2x32xf32, #tpu.memory_space<vmem>>, %arg8: memref<1x2x32xf32, #tpu.memory_space<vmem>>, %arg9: memref<1x2x32xf32, #tpu.memory_space<vmem>>, %arg10: memref<8x2x32xf32, #tpu.memory_space<vmem>>) attributes {dimension_semantics = [#tpu.dimension_semantics<parallel>, #tpu.dimension_semantics<arbitrary>], iteration_bounds = array<i64: 1, 2>, scalar_prefetch = 0 : i64, scratch_operands = 1 : i64, tpu.core_type = #tpu.core_type<tc>, window_params = [{transform_indices = @transform_0, window_bounds = array<i64: 8, 2, 128>}, {transform_indices = @transform_1, window_bounds = array<i64: 1, 32, 128>}, {transform_indices = @transform_2, window_bounds = array<i64: 1, 32, 128>}, {transform_indices = @transform_3, window_bounds = array<i64: 1, 1, 128>}, {transform_indices = @transform_4, window_bounds = array<i64: 1, 2, 32>}, {transform_indices = @transform_5, window_bounds = array<i64: 1, 2, 32>}, {transform_indices = @transform_6, window_bounds = array<i64: 1, 2, 32>}, {transform_indices = @transform_7, window_bounds = array<i64: 1, 2, 32>}]} {
    %c0 = arith.constant 0 : index
    %c0_0 = arith.constant 0 : index
    %c0_1 = arith.constant 0 : index
    %0 = vector.load %arg4[%c0, %c0_0, %c0_1] : memref<1x32x128xf32, #tpu.memory_space<vmem>>, vector<1x32x128xf32>
    %1 = vector.shape_cast %0 : vector<1x32x128xf32> to vector<32x128xf32>
    %c0_2 = arith.constant 0 : index
    %c0_3 = arith.constant 0 : index
    %c0_4 = arith.constant 0 : index
    %2 = vector.load %arg6[%c0_2, %c0_3, %c0_4] : memref<1x2x32xf32, #tpu.memory_space<vmem>>, vector<1x2x32xf32>
    %3 = vector.shape_cast %2 : vector<1x2x32xf32> to vector<2x32xf32>
    %c0_5 = arith.constant 0 : index
    %c0_6 = arith.constant 0 : index
    %c0_7 = arith.constant 0 : index
    %4 = vector.load %arg7[%c0_5, %c0_6, %c0_7] : memref<1x2x32xf32, #tpu.memory_space<vmem>>, vector<1x2x32xf32>
    %5 = vector.shape_cast %4 : vector<1x2x32xf32> to vector<2x32xf32>
    %c0_i32 = arith.constant 0 : i32
    %6 = arith.cmpi eq, %arg1, %c0_i32 : i32
    %7 = arith.extui %6 : i1 to i32
    %c0_i32_8 = arith.constant 0 : i32
    %8 = arith.cmpi ne, %7, %c0_i32_8 : i32
    %9 = scf.if %8 -> (vector<8x2x128xf32>) {
      %c0_47 = arith.constant 0 : index
      %c0_48 = arith.constant 0 : index
      %c0_49 = arith.constant 0 : index
      %200 = vector.load %arg2[%c0_47, %c0_48, %c0_49] : memref<8x2x128xf32, #tpu.memory_space<vmem>>, vector<8x2x128xf32>
      scf.yield %200 : vector<8x2x128xf32>
    } else {
      %c0_47 = arith.constant 0 : index
      %c0_48 = arith.constant 0 : index
      %c0_49 = arith.constant 0 : index
      %200 = vector.load %arg10[%c0_47, %c0_48, %c0_49] : memref<8x2x32xf32, #tpu.memory_space<vmem>>, vector<8x2x32xf32>
      %c0_50 = arith.constant 0 : index
      %c0_51 = arith.constant 0 : index
      %c0_52 = arith.constant 0 : index
      %201 = vector.load %arg3[%c0_50, %c0_51, %c0_52] : memref<1x32x128xf32, #tpu.memory_space<vmem>>, vector<1x32x128xf32>
      %202 = vector.shape_cast %201 : vector<1x32x128xf32> to vector<32x128xf32>
      %cst_53 = arith.constant dense<0.000000e+00> : vector<8x2x128xf32>
      %203 = tpu.matmul %200, %202, %cst_53 {dimension_numbers = #tpu.dot_dimension_numbers<[2], [0], [0, 1], [1], [0, 0, 0, 1, 1, 1], [], []>} : vector<8x2x32xf32>, vector<32x128xf32>, vector<8x2x128xf32> -> vector<8x2x128xf32>
      %c0_54 = arith.constant 0 : index
      %c0_55 = arith.constant 0 : index
      %c0_56 = arith.constant 0 : index
      %204 = vector.load %arg5[%c0_54, %c0_55, %c0_56] : memref<1x1x128xf32, #tpu.memory_space<vmem>>, vector<1x1x128xf32>
      %205 = vector.shape_cast %204 : vector<1x1x128xf32> to vector<1x128xf32>
      %206 = vector.shape_cast %205 : vector<1x128xf32> to vector<1x1x128xf32>
      %207 = vector.broadcast %206 : vector<1x1x128xf32> to vector<8x2x128xf32>
      %208 = arith.addf %203, %207 : vector<8x2x128xf32>
      scf.yield %208 : vector<8x2x128xf32>
    }
    %10 = vector.extract_strided_slice %9 {offsets = [0, 0, 0], sizes = [1, 2, 128], strides = [1, 1, 1]} : vector<8x2x128xf32> to vector<1x2x128xf32>
    %11 = vector.shape_cast %10 : vector<1x2x128xf32> to vector<2x128xf32>
    %cst = arith.constant dense<0.000000e+00> : vector<2x128xf32>
    %12 = tpu.matmul %3, %1, %cst {dimension_numbers = #tpu.dot_dimension_numbers<[1], [0], [0], [1], [0, 0, 1, 1], [], []>} : vector<2x32xf32>, vector<32x128xf32>, vector<2x128xf32> -> vector<2x128xf32>
    %13 = arith.addf %11, %12 : vector<2x128xf32>
    %14 = vector.extract_strided_slice %13 {offsets = [0, 0], sizes = [2, 96], strides = [1, 1]} : vector<2x128xf32> to vector<2x96xf32>
    %15 = arith.negf %14 : vector<2x96xf32>
    %16 = math.exp %15 : vector<2x96xf32>
    %cst_9 = arith.constant 1.000000e+00 : f32
    %17 = vector.broadcast %cst_9 : f32 to vector<2x96xf32>
    %18 = arith.addf %17, %16 : vector<2x96xf32>
    %19 = arith.divf %17, %18 : vector<2x96xf32>
    %20 = vector.extract_strided_slice %19 {offsets = [0, 0], sizes = [2, 32], strides = [1, 1]} : vector<2x96xf32> to vector<2x32xf32>
    %21 = vector.extract_strided_slice %19 {offsets = [0, 32], sizes = [2, 32], strides = [1, 1]} : vector<2x96xf32> to vector<2x32xf32>
    %22 = vector.extract_strided_slice %19 {offsets = [0, 64], sizes = [2, 32], strides = [1, 1]} : vector<2x96xf32> to vector<2x32xf32>
    %23 = vector.extract_strided_slice %13 {offsets = [0, 96], sizes = [2, 32], strides = [1, 1]} : vector<2x128xf32> to vector<2x32xf32>
    %24 = math.tanh %23 : vector<2x32xf32>
    %25 = arith.mulf %21, %5 : vector<2x32xf32>
    %26 = arith.mulf %20, %24 : vector<2x32xf32>
    %27 = arith.addf %25, %26 : vector<2x32xf32>
    %28 = math.tanh %27 : vector<2x32xf32>
    %29 = arith.mulf %22, %28 : vector<2x32xf32>
    %c0_10 = arith.constant 0 : index
    %c0_11 = arith.constant 0 : index
    %c0_12 = arith.constant 0 : index
    %30 = vector.load %arg10[%c0_10, %c0_11, %c0_12] : memref<8x2x32xf32, #tpu.memory_space<vmem>>, vector<1x2x32xf32>
    %31 = vector.shape_cast %30 : vector<1x2x32xf32> to vector<2x32xf32>
    %32 = vector.shape_cast %29 : vector<2x32xf32> to vector<1x2x32xf32>
    tpu.vector_store %arg10[%c0_10, %c0_11, %c0_12], %32 {strides = array<i32>} : memref<8x2x32xf32, #tpu.memory_space<vmem>>, vector<1x2x32xf32>,
    %33 = vector.extract_strided_slice %9 {offsets = [1, 0, 0], sizes = [1, 2, 128], strides = [1, 1, 1]} : vector<8x2x128xf32> to vector<1x2x128xf32>
    %34 = vector.shape_cast %33 : vector<1x2x128xf32> to vector<2x128xf32>
    %cst_13 = arith.constant dense<0.000000e+00> : vector<2x128xf32>
    %35 = tpu.matmul %29, %1, %cst_13 {dimension_numbers = #tpu.dot_dimension_numbers<[1], [0], [0], [1], [0, 0, 1, 1], [], []>} : vector<2x32xf32>, vector<32x128xf32>, vector<2x128xf32> -> vector<2x128xf32>
    %36 = arith.addf %34, %35 : vector<2x128xf32>
    %37 = vector.extract_strided_slice %36 {offsets = [0, 0], sizes = [2, 96], strides = [1, 1]} : vector<2x128xf32> to vector<2x96xf32>
    %38 = arith.negf %37 : vector<2x96xf32>
    %39 = math.exp %38 : vector<2x96xf32>
    %cst_14 = arith.constant 1.000000e+00 : f32
    %40 = vector.broadcast %cst_14 : f32 to vector<2x96xf32>
    %41 = arith.addf %40, %39 : vector<2x96xf32>
    %42 = arith.divf %40, %41 : vector<2x96xf32>
    %43 = vector.extract_strided_slice %42 {offsets = [0, 0], sizes = [2, 32], strides = [1, 1]} : vector<2x96xf32> to vector<2x32xf32>
    %44 = vector.extract_strided_slice %42 {offsets = [0, 32], sizes = [2, 32], strides = [1, 1]} : vector<2x96xf32> to vector<2x32xf32>
    %45 = vector.extract_strided_slice %42 {offsets = [0, 64], sizes = [2, 32], strides = [1, 1]} : vector<2x96xf32> to vector<2x32xf32>
    %46 = vector.extract_strided_slice %36 {offsets = [0, 96], sizes = [2, 32], strides = [1, 1]} : vector<2x128xf32> to vector<2x32xf32>
    %47 = math.tanh %46 : vector<2x32xf32>
    %48 = arith.mulf %44, %27 : vector<2x32xf32>
    %49 = arith.mulf %43, %47 : vector<2x32xf32>
    %50 = arith.addf %48, %49 : vector<2x32xf32>
    %51 = math.tanh %50 : vector<2x32xf32>
    %52 = arith.mulf %45, %51 : vector<2x32xf32>
    %c1 = arith.constant 1 : index
    %c0_15 = arith.constant 0 : index
    %c0_16 = arith.constant 0 : index
    %53 = vector.load %arg10[%c1, %c0_15, %c0_16] : memref<8x2x32xf32, #tpu.memory_space<vmem>>, vector<1x2x32xf32>
    %54 = vector.shape_cast %53 : vector<1x2x32xf32> to vector<2x32xf32>
    %55 = vector.shape_cast %52 : vector<2x32xf32> to vector<1x2x32xf32>
    tpu.vector_store %arg10[%c1, %c0_15, %c0_16], %55 {strides = array<i32>} : memref<8x2x32xf32, #tpu.memory_space<vmem>>, vector<1x2x32xf32>,
    %56 = vector.extract_strided_slice %9 {offsets = [2, 0, 0], sizes = [1, 2, 128], strides = [1, 1, 1]} : vector<8x2x128xf32> to vector<1x2x128xf32>
    %57 = vector.shape_cast %56 : vector<1x2x128xf32> to vector<2x128xf32>
    %cst_17 = arith.constant dense<0.000000e+00> : vector<2x128xf32>
    %58 = tpu.matmul %52, %1, %cst_17 {dimension_numbers = #tpu.dot_dimension_numbers<[1], [0], [0], [1], [0, 0, 1, 1], [], []>} : vector<2x32xf32>, vector<32x128xf32>, vector<2x128xf32> -> vector<2x128xf32>
    %59 = arith.addf %57, %58 : vector<2x128xf32>
    %60 = vector.extract_strided_slice %59 {offsets = [0, 0], sizes = [2, 96], strides = [1, 1]} : vector<2x128xf32> to vector<2x96xf32>
    %61 = arith.negf %60 : vector<2x96xf32>
    %62 = math.exp %61 : vector<2x96xf32>
    %cst_18 = arith.constant 1.000000e+00 : f32
    %63 = vector.broadcast %cst_18 : f32 to vector<2x96xf32>
    %64 = arith.addf %63, %62 : vector<2x96xf32>
    %65 = arith.divf %63, %64 : vector<2x96xf32>
    %66 = vector.extract_strided_slice %65 {offsets = [0, 0], sizes = [2, 32], strides = [1, 1]} : vector<2x96xf32> to vector<2x32xf32>
    %67 = vector.extract_strided_slice %65 {offsets = [0, 32], sizes = [2, 32], strides = [1, 1]} : vector<2x96xf32> to vector<2x32xf32>
    %68 = vector.extract_strided_slice %65 {offsets = [0, 64], sizes = [2, 32], strides = [1, 1]} : vector<2x96xf32> to vector<2x32xf32>
    %69 = vector.extract_strided_slice %59 {offsets = [0, 96], sizes = [2, 32], strides = [1, 1]} : vector<2x128xf32> to vector<2x32xf32>
    %70 = math.tanh %69 : vector<2x32xf32>
    %71 = arith.mulf %67, %50 : vector<2x32xf32>
    %72 = arith.mulf %66, %70 : vector<2x32xf32>
    %73 = arith.addf %71, %72 : vector<2x32xf32>
    %74 = math.tanh %73 : vector<2x32xf32>
    %75 = arith.mulf %68, %74 : vector<2x32xf32>
    %c2 = arith.constant 2 : index
    %c0_19 = arith.constant 0 : index
    %c0_20 = arith.constant 0 : index
    %76 = vector.load %arg10[%c2, %c0_19, %c0_20] : memref<8x2x32xf32, #tpu.memory_space<vmem>>, vector<1x2x32xf32>
    %77 = vector.shape_cast %76 : vector<1x2x32xf32> to vector<2x32xf32>
    %78 = vector.shape_cast %75 : vector<2x32xf32> to vector<1x2x32xf32>
    tpu.vector_store %arg10[%c2, %c0_19, %c0_20], %78 {strides = array<i32>} : memref<8x2x32xf32, #tpu.memory_space<vmem>>, vector<1x2x32xf32>,
    %79 = vector.extract_strided_slice %9 {offsets = [3, 0, 0], sizes = [1, 2, 128], strides = [1, 1, 1]} : vector<8x2x128xf32> to vector<1x2x128xf32>
    %80 = vector.shape_cast %79 : vector<1x2x128xf32> to vector<2x128xf32>
    %cst_21 = arith.constant dense<0.000000e+00> : vector<2x128xf32>
    %81 = tpu.matmul %75, %1, %cst_21 {dimension_numbers = #tpu.dot_dimension_numbers<[1], [0], [0], [1], [0, 0, 1, 1], [], []>} : vector<2x32xf32>, vector<32x128xf32>, vector<2x128xf32> -> vector<2x128xf32>
    %82 = arith.addf %80, %81 : vector<2x128xf32>
    %83 = vector.extract_strided_slice %82 {offsets = [0, 0], sizes = [2, 96], strides = [1, 1]} : vector<2x128xf32> to vector<2x96xf32>
    %84 = arith.negf %83 : vector<2x96xf32>
    %85 = math.exp %84 : vector<2x96xf32>
    %cst_22 = arith.constant 1.000000e+00 : f32
    %86 = vector.broadcast %cst_22 : f32 to vector<2x96xf32>
    %87 = arith.addf %86, %85 : vector<2x96xf32>
    %88 = arith.divf %86, %87 : vector<2x96xf32>
    %89 = vector.extract_strided_slice %88 {offsets = [0, 0], sizes = [2, 32], strides = [1, 1]} : vector<2x96xf32> to vector<2x32xf32>
    %90 = vector.extract_strided_slice %88 {offsets = [0, 32], sizes = [2, 32], strides = [1, 1]} : vector<2x96xf32> to vector<2x32xf32>
    %91 = vector.extract_strided_slice %88 {offsets = [0, 64], sizes = [2, 32], strides = [1, 1]} : vector<2x96xf32> to vector<2x32xf32>
    %92 = vector.extract_strided_slice %82 {offsets = [0, 96], sizes = [2, 32], strides = [1, 1]} : vector<2x128xf32> to vector<2x32xf32>
    %93 = math.tanh %92 : vector<2x32xf32>
    %94 = arith.mulf %90, %73 : vector<2x32xf32>
    %95 = arith.mulf %89, %93 : vector<2x32xf32>
    %96 = arith.addf %94, %95 : vector<2x32xf32>
    %97 = math.tanh %96 : vector<2x32xf32>
    %98 = arith.mulf %91, %97 : vector<2x32xf32>
    %c3 = arith.constant 3 : index
    %c0_23 = arith.constant 0 : index
    %c0_24 = arith.constant 0 : index
    %99 = vector.load %arg10[%c3, %c0_23, %c0_24] : memref<8x2x32xf32, #tpu.memory_space<vmem>>, vector<1x2x32xf32>
    %100 = vector.shape_cast %99 : vector<1x2x32xf32> to vector<2x32xf32>
    %101 = vector.shape_cast %98 : vector<2x32xf32> to vector<1x2x32xf32>
    tpu.vector_store %arg10[%c3, %c0_23, %c0_24], %101 {strides = array<i32>} : memref<8x2x32xf32, #tpu.memory_space<vmem>>, vector<1x2x32xf32>,
    %102 = vector.extract_strided_slice %9 {offsets = [4, 0, 0], sizes = [1, 2, 128], strides = [1, 1, 1]} : vector<8x2x128xf32> to vector<1x2x128xf32>
    %103 = vector.shape_cast %102 : vector<1x2x128xf32> to vector<2x128xf32>
    %cst_25 = arith.constant dense<0.000000e+00> : vector<2x128xf32>
    %104 = tpu.matmul %98, %1, %cst_25 {dimension_numbers = #tpu.dot_dimension_numbers<[1], [0], [0], [1], [0, 0, 1, 1], [], []>} : vector<2x32xf32>, vector<32x128xf32>, vector<2x128xf32> -> vector<2x128xf32>
    %105 = arith.addf %103, %104 : vector<2x128xf32>
    %106 = vector.extract_strided_slice %105 {offsets = [0, 0], sizes = [2, 96], strides = [1, 1]} : vector<2x128xf32> to vector<2x96xf32>
    %107 = arith.negf %106 : vector<2x96xf32>
    %108 = math.exp %107 : vector<2x96xf32>
    %cst_26 = arith.constant 1.000000e+00 : f32
    %109 = vector.broadcast %cst_26 : f32 to vector<2x96xf32>
    %110 = arith.addf %109, %108 : vector<2x96xf32>
    %111 = arith.divf %109, %110 : vector<2x96xf32>
    %112 = vector.extract_strided_slice %111 {offsets = [0, 0], sizes = [2, 32], strides = [1, 1]} : vector<2x96xf32> to vector<2x32xf32>
    %113 = vector.extract_strided_slice %111 {offsets = [0, 32], sizes = [2, 32], strides = [1, 1]} : vector<2x96xf32> to vector<2x32xf32>
    %114 = vector.extract_strided_slice %111 {offsets = [0, 64], sizes = [2, 32], strides = [1, 1]} : vector<2x96xf32> to vector<2x32xf32>
    %115 = vector.extract_strided_slice %105 {offsets = [0, 96], sizes = [2, 32], strides = [1, 1]} : vector<2x128xf32> to vector<2x32xf32>
    %116 = math.tanh %115 : vector<2x32xf32>
    %117 = arith.mulf %113, %96 : vector<2x32xf32>
    %118 = arith.mulf %112, %116 : vector<2x32xf32>
    %119 = arith.addf %117, %118 : vector<2x32xf32>
    %120 = math.tanh %119 : vector<2x32xf32>
    %121 = arith.mulf %114, %120 : vector<2x32xf32>
    %c4 = arith.constant 4 : index
    %c0_27 = arith.constant 0 : index
    %c0_28 = arith.constant 0 : index
    %122 = vector.load %arg10[%c4, %c0_27, %c0_28] : memref<8x2x32xf32, #tpu.memory_space<vmem>>, vector<1x2x32xf32>
    %123 = vector.shape_cast %122 : vector<1x2x32xf32> to vector<2x32xf32>
    %124 = vector.shape_cast %121 : vector<2x32xf32> to vector<1x2x32xf32>
    tpu.vector_store %arg10[%c4, %c0_27, %c0_28], %124 {strides = array<i32>} : memref<8x2x32xf32, #tpu.memory_space<vmem>>, vector<1x2x32xf32>,
    %125 = vector.extract_strided_slice %9 {offsets = [5, 0, 0], sizes = [1, 2, 128], strides = [1, 1, 1]} : vector<8x2x128xf32> to vector<1x2x128xf32>
    %126 = vector.shape_cast %125 : vector<1x2x128xf32> to vector<2x128xf32>
    %cst_29 = arith.constant dense<0.000000e+00> : vector<2x128xf32>
    %127 = tpu.matmul %121, %1, %cst_29 {dimension_numbers = #tpu.dot_dimension_numbers<[1], [0], [0], [1], [0, 0, 1, 1], [], []>} : vector<2x32xf32>, vector<32x128xf32>, vector<2x128xf32> -> vector<2x128xf32>
    %128 = arith.addf %126, %127 : vector<2x128xf32>
    %129 = vector.extract_strided_slice %128 {offsets = [0, 0], sizes = [2, 96], strides = [1, 1]} : vector<2x128xf32> to vector<2x96xf32>
    %130 = arith.negf %129 : vector<2x96xf32>
    %131 = math.exp %130 : vector<2x96xf32>
    %cst_30 = arith.constant 1.000000e+00 : f32
    %132 = vector.broadcast %cst_30 : f32 to vector<2x96xf32>
    %133 = arith.addf %132, %131 : vector<2x96xf32>
    %134 = arith.divf %132, %133 : vector<2x96xf32>
    %135 = vector.extract_strided_slice %134 {offsets = [0, 0], sizes = [2, 32], strides = [1, 1]} : vector<2x96xf32> to vector<2x32xf32>
    %136 = vector.extract_strided_slice %134 {offsets = [0, 32], sizes = [2, 32], strides = [1, 1]} : vector<2x96xf32> to vector<2x32xf32>
    %137 = vector.extract_strided_slice %134 {offsets = [0, 64], sizes = [2, 32], strides = [1, 1]} : vector<2x96xf32> to vector<2x32xf32>
    %138 = vector.extract_strided_slice %128 {offsets = [0, 96], sizes = [2, 32], strides = [1, 1]} : vector<2x128xf32> to vector<2x32xf32>
    %139 = math.tanh %138 : vector<2x32xf32>
    %140 = arith.mulf %136, %119 : vector<2x32xf32>
    %141 = arith.mulf %135, %139 : vector<2x32xf32>
    %142 = arith.addf %140, %141 : vector<2x32xf32>
    %143 = math.tanh %142 : vector<2x32xf32>
    %144 = arith.mulf %137, %143 : vector<2x32xf32>
    %c5 = arith.constant 5 : index
    %c0_31 = arith.constant 0 : index
    %c0_32 = arith.constant 0 : index
    %145 = vector.load %arg10[%c5, %c0_31, %c0_32] : memref<8x2x32xf32, #tpu.memory_space<vmem>>, vector<1x2x32xf32>
    %146 = vector.shape_cast %145 : vector<1x2x32xf32> to vector<2x32xf32>
    %147 = vector.shape_cast %144 : vector<2x32xf32> to vector<1x2x32xf32>
    tpu.vector_store %arg10[%c5, %c0_31, %c0_32], %147 {strides = array<i32>} : memref<8x2x32xf32, #tpu.memory_space<vmem>>, vector<1x2x32xf32>,
    %148 = vector.extract_strided_slice %9 {offsets = [6, 0, 0], sizes = [1, 2, 128], strides = [1, 1, 1]} : vector<8x2x128xf32> to vector<1x2x128xf32>
    %149 = vector.shape_cast %148 : vector<1x2x128xf32> to vector<2x128xf32>
    %cst_33 = arith.constant dense<0.000000e+00> : vector<2x128xf32>
    %150 = tpu.matmul %144, %1, %cst_33 {dimension_numbers = #tpu.dot_dimension_numbers<[1], [0], [0], [1], [0, 0, 1, 1], [], []>} : vector<2x32xf32>, vector<32x128xf32>, vector<2x128xf32> -> vector<2x128xf32>
    %151 = arith.addf %149, %150 : vector<2x128xf32>
    %152 = vector.extract_strided_slice %151 {offsets = [0, 0], sizes = [2, 96], strides = [1, 1]} : vector<2x128xf32> to vector<2x96xf32>
    %153 = arith.negf %152 : vector<2x96xf32>
    %154 = math.exp %153 : vector<2x96xf32>
    %cst_34 = arith.constant 1.000000e+00 : f32
    %155 = vector.broadcast %cst_34 : f32 to vector<2x96xf32>
    %156 = arith.addf %155, %154 : vector<2x96xf32>
    %157 = arith.divf %155, %156 : vector<2x96xf32>
    %158 = vector.extract_strided_slice %157 {offsets = [0, 0], sizes = [2, 32], strides = [1, 1]} : vector<2x96xf32> to vector<2x32xf32>
    %159 = vector.extract_strided_slice %157 {offsets = [0, 32], sizes = [2, 32], strides = [1, 1]} : vector<2x96xf32> to vector<2x32xf32>
    %160 = vector.extract_strided_slice %157 {offsets = [0, 64], sizes = [2, 32], strides = [1, 1]} : vector<2x96xf32> to vector<2x32xf32>
    %161 = vector.extract_strided_slice %151 {offsets = [0, 96], sizes = [2, 32], strides = [1, 1]} : vector<2x128xf32> to vector<2x32xf32>
    %162 = math.tanh %161 : vector<2x32xf32>
    %163 = arith.mulf %159, %142 : vector<2x32xf32>
    %164 = arith.mulf %158, %162 : vector<2x32xf32>
    %165 = arith.addf %163, %164 : vector<2x32xf32>
    %166 = math.tanh %165 : vector<2x32xf32>
    %167 = arith.mulf %160, %166 : vector<2x32xf32>
    %c6 = arith.constant 6 : index
    %c0_35 = arith.constant 0 : index
    %c0_36 = arith.constant 0 : index
    %168 = vector.load %arg10[%c6, %c0_35, %c0_36] : memref<8x2x32xf32, #tpu.memory_space<vmem>>, vector<1x2x32xf32>
    %169 = vector.shape_cast %168 : vector<1x2x32xf32> to vector<2x32xf32>
    %170 = vector.shape_cast %167 : vector<2x32xf32> to vector<1x2x32xf32>
    tpu.vector_store %arg10[%c6, %c0_35, %c0_36], %170 {strides = array<i32>} : memref<8x2x32xf32, #tpu.memory_space<vmem>>, vector<1x2x32xf32>,
    %171 = vector.extract_strided_slice %9 {offsets = [7, 0, 0], sizes = [1, 2, 128], strides = [1, 1, 1]} : vector<8x2x128xf32> to vector<1x2x128xf32>
    %172 = vector.shape_cast %171 : vector<1x2x128xf32> to vector<2x128xf32>
    %cst_37 = arith.constant dense<0.000000e+00> : vector<2x128xf32>
    %173 = tpu.matmul %167, %1, %cst_37 {dimension_numbers = #tpu.dot_dimension_numbers<[1], [0], [0], [1], [0, 0, 1, 1], [], []>} : vector<2x32xf32>, vector<32x128xf32>, vector<2x128xf32> -> vector<2x128xf32>
    %174 = arith.addf %172, %173 : vector<2x128xf32>
    %175 = vector.extract_strided_slice %174 {offsets = [0, 0], sizes = [2, 96], strides = [1, 1]} : vector<2x128xf32> to vector<2x96xf32>
    %176 = arith.negf %175 : vector<2x96xf32>
    %177 = math.exp %176 : vector<2x96xf32>
    %cst_38 = arith.constant 1.000000e+00 : f32
    %178 = vector.broadcast %cst_38 : f32 to vector<2x96xf32>
    %179 = arith.addf %178, %177 : vector<2x96xf32>
    %180 = arith.divf %178, %179 : vector<2x96xf32>
    %181 = vector.extract_strided_slice %180 {offsets = [0, 0], sizes = [2, 32], strides = [1, 1]} : vector<2x96xf32> to vector<2x32xf32>
    %182 = vector.extract_strided_slice %180 {offsets = [0, 32], sizes = [2, 32], strides = [1, 1]} : vector<2x96xf32> to vector<2x32xf32>
    %183 = vector.extract_strided_slice %180 {offsets = [0, 64], sizes = [2, 32], strides = [1, 1]} : vector<2x96xf32> to vector<2x32xf32>
    %184 = vector.extract_strided_slice %174 {offsets = [0, 96], sizes = [2, 32], strides = [1, 1]} : vector<2x128xf32> to vector<2x32xf32>
    %185 = math.tanh %184 : vector<2x32xf32>
    %186 = arith.mulf %182, %165 : vector<2x32xf32>
    %187 = arith.mulf %181, %185 : vector<2x32xf32>
    %188 = arith.addf %186, %187 : vector<2x32xf32>
    %189 = math.tanh %188 : vector<2x32xf32>
    %190 = arith.mulf %183, %189 : vector<2x32xf32>
    %c7 = arith.constant 7 : index
    %c0_39 = arith.constant 0 : index
    %c0_40 = arith.constant 0 : index
    %191 = vector.load %arg10[%c7, %c0_39, %c0_40] : memref<8x2x32xf32, #tpu.memory_space<vmem>>, vector<1x2x32xf32>
    %192 = vector.shape_cast %191 : vector<1x2x32xf32> to vector<2x32xf32>
    %193 = vector.shape_cast %190 : vector<2x32xf32> to vector<1x2x32xf32>
    tpu.vector_store %arg10[%c7, %c0_39, %c0_40], %193 {strides = array<i32>} : memref<8x2x32xf32, #tpu.memory_space<vmem>>, vector<1x2x32xf32>,
    %c0_41 = arith.constant 0 : index
    %c0_42 = arith.constant 0 : index
    %c0_43 = arith.constant 0 : index
    %194 = vector.load %arg8[%c0_41, %c0_42, %c0_43] : memref<1x2x32xf32, #tpu.memory_space<vmem>>, vector<1x2x32xf32>
    %195 = vector.shape_cast %194 : vector<1x2x32xf32> to vector<2x32xf32>
    %196 = vector.shape_cast %190 : vector<2x32xf32> to vector<1x2x32xf32>
    tpu.vector_store %arg8[%c0_41, %c0_42, %c0_43], %196 {strides = array<i32>} : memref<1x2x32xf32, #tpu.memory_space<vmem>>, vector<1x2x32xf32>,
    %c0_44 = arith.constant 0 : index
    %c0_45 = arith.constant 0 : index
    %c0_46 = arith.constant 0 : index
    %197 = vector.load %arg9[%c0_44, %c0_45, %c0_46] : memref<1x2x32xf32, #tpu.memory_space<vmem>>, vector<1x2x32xf32>
    %198 = vector.shape_cast %197 : vector<1x2x32xf32> to vector<2x32xf32>
    %199 = vector.shape_cast %188 : vector<2x32xf32> to vector<1x2x32xf32>
    tpu.vector_store %arg9[%c0_44, %c0_45, %c0_46], %199 {strides = array<i32>} : memref<1x2x32xf32, #tpu.memory_space<vmem>>, vector<1x2x32xf32>,
    return
  }
  func.func @transform_0(%arg0: i32, %arg1: i32) -> (i32, i32, i32) {
    %c0_i32 = arith.constant 0 : i32
    %c0_i32_0 = arith.constant 0 : i32
    %c0_i32_1 = arith.constant 0 : i32
    return %c0_i32, %arg0, %c0_i32_0 : i32, i32, i32
  }
  func.func @transform_1(%arg0: i32, %arg1: i32) -> (i32, i32, i32) {
    %c0_i32 = arith.constant 0 : i32
    %c0_i32_0 = arith.constant 0 : i32
    %c0_i32_1 = arith.constant 0 : i32
    return %arg1, %c0_i32, %c0_i32_0 : i32, i32, i32
  }
  func.func @transform_2(%arg0: i32, %arg1: i32) -> (i32, i32, i32) {
    %c0_i32 = arith.constant 0 : i32
    %c0_i32_0 = arith.constant 0 : i32
    %c0_i32_1 = arith.constant 0 : i32
    return %arg1, %c0_i32, %c0_i32_0 : i32, i32, i32
  }
  func.func @transform_3(%arg0: i32, %arg1: i32) -> (i32, i32, i32) {
    %c0_i32 = arith.constant 0 : i32
    %c0_i32_0 = arith.constant 0 : i32
    %c0_i32_1 = arith.constant 0 : i32
    return %arg1, %c0_i32, %c0_i32_0 : i32, i32, i32
  }
  func.func @transform_4(%arg0: i32, %arg1: i32) -> (i32, i32, i32) {
    %c0_i32 = arith.constant 0 : i32
    %c0_i32_0 = arith.constant 0 : i32
    return %arg1, %arg0, %c0_i32 : i32, i32, i32
  }
  func.func @transform_5(%arg0: i32, %arg1: i32) -> (i32, i32, i32) {
    %c0_i32 = arith.constant 0 : i32
    %c0_i32_0 = arith.constant 0 : i32
    return %arg1, %arg0, %c0_i32 : i32, i32, i32
  }
  func.func @transform_6(%arg0: i32, %arg1: i32) -> (i32, i32, i32) {
    %c0_i32 = arith.constant 0 : i32
    %c0_i32_0 = arith.constant 0 : i32
    return %arg1, %arg0, %c0_i32 : i32, i32, i32
  }
  func.func @transform_7(%arg0: i32, %arg1: i32) -> (i32, i32, i32) {
    %c0_i32 = arith.constant 0 : i32
    %c0_i32_0 = arith.constant 0 : i32
    return %arg1, %arg0, %c0_i32 : i32, i32, i32
  }
}

</mosaic_0001>

<bundles_post_ra>
// kernel: tpu_custom_call.1
= control target key start
LH: loop header
LB: loop body
LE: loop exit
PB: predicated region body
PF: predicated region fallthrough
CT: control target
= control target key end

     0   :  { %s3117_s0 = inlined_call_operand.hbm [shape: f32[8,2,128], index: 0, kind: input, shape index: {}]   ;;  %s3118_s1 = inlined_call_operand.hbm [shape: f32[2,32,128], index: 1, kind: input, shape index: {}]   ;;  %s3119_s2 = inlined_call_operand.hbm [shape: f32[2,32,128], index: 2, kind: input, shape index: {}]   ;;  %s3120_s3 = inlined_call_operand.vmem [shape: f32[2,1,128], index: 3, kind: input, shape index: {}]   ;;  %s3121_s4 = inlined_call_operand.vmem [shape: f32[2,2,32], index: 4, kind: input, shape index: {}]   ;;  %s3122_s5 = inlined_call_operand.vmem [shape: f32[2,2,32], index: 5, kind: input, shape index: {}]   ;;  %s3123_s6 = inlined_call_operand.hbm [shape: f32[2,2,32], index: 6, kind: output, shape index: {0}]   ;;  %s3124_s7 = inlined_call_operand.hbm [shape: f32[2,2,32], index: 7, kind: output, shape index: {1}]  }
   0x1   :  { %3132 = sst [smem:[#allocation17_spill]] %s3117_s0 }
   0x2   :  { %3133 = sst [smem:[#allocation18_spill]] %s3118_s1 }
   0x3   :  { %13 = vsyncpa [#allocation4], 0 }
   0x4   :  { %14 = vsyncpa [#allocation7], 0 }
   0x5   :  { %16 = vsyncpa [#allocation7 + $0x1], 0 }
   0x6   :  { %17 = vsyncpa [#allocation5], 0 }
   0x7   :  { %19 = vsyncpa [#allocation5 + $0x1], 0 }
   0x8   :  { %20 = vsyncpa [#allocation11], 0 }
   0x9   :  { %22 = vsyncpa [#allocation11 + $0x1], 0  ;;  %s2571_s24 = smov 0   ;;  %s2573_s25 = smov 0  }
   0xa   :  { %s2575_s26 = smov 0   ;;  %s2577_s27 = smov 0  }
   0xb   :  { %s2579_s28 = smov 0   ;;  %s2581_s29 = smov 0  }
   0xc LB: > { %s37_s30 = sadd.s32 1, %s2477_s28  ;;  %s73_s8 = sadd.s32 1, %s2469_s26  ;;  %s2481_s29 = sphi %s2581_s29, %s28_s29   ;;  %s2477_s28 = sphi %s2579_s28, %s3163_s28   ;;  %s2473_s27 = sphi %s2577_s27, %s3162_s27   ;;  %s2469_s26 = sphi %s2575_s26, %s3161_s26   ;;  %s2465_s25 = sphi %s2573_s25, %s3160_s25   ;;  %s2461_s24 = sphi %s2571_s24, %s3159_s24  }
   0xd   : > { %p38_p0 = scmp.ge.s32.totalorder %s37_s30, 2  ;;  %p80_p1 = scmp.ne.s32.totalorder %s2469_s26, %s2465_s25 }
   0xe   : > { %p81_p2 = scmp.eq.s32.totalorder %s2481_s29, 0  ;;  %p2051_p5 = scmp.lt.s32.totalorder %s2481_s29, 2 }
   0xf   : > { %s3165_s30 = smov (%p38_p0, %s37_s30), 0  ;;  %s289_s10 = sand.u32 1, %s2481_s29  }
  0x10   : > { %3134 = sst [smem:[#allocation16_spill]] %s3165_s30  ;;  %p82_p4 = por %p81_p2, %p80_p1 }
  0x11   : > { %s70_s9 = ssub.s32 %s2477_s28, %s3165_s30  ;;  %s291_s11 = sand.u32 1, %s2469_s26  }
  0x12   : > { %p71_p6 = scmp.eq.s32.totalorder %s70_s9, 0  ;;  %s1784_s12 = sshll.u32 %s2477_s28, 9 }
  0x13   : > { %s2621_s14 = sshll.u32 %s291_s11, 5  ;;  %s3135_s1 = sld [smem:[#allocation18_spill]] }
  0x14   : > { %s2619_s13 = scalar_select %p71_p6, %s2469_s26, %s73_s8  }
  0x15   : > { %p2630_p7 = pnand %p2051_p5, %p82_p4  ;;  %s293_s19 = scalar_lea.vmem [#allocation6], %s2621_s14 }
  0x16   : > { %s300_s20 = sshll.u32 %s293_s19, 4  ;;  %s2637_s21 = scalar_lea.sflag [#allocation7], %s289_s10  ;;  %s2635_s20 = int_to_ptr.vmem [resolvable:$true] %s300_s20 }
  0x17   : > { %p2245_p9 = pneg %p2630_p7 }
  0x19   : > { %s2628_s17 = scalar_lea.hbm %s3135_s1, %s1784_s12  ;;  %s2248_s9 = scalar_lea.hbm %s3135_s1, 1024 }
  0x1a   : > { %s2243_s22 = scalar_lea.hbm %s2628_s17, 512  ;;  %p2249_p12 = scmp.lt.u32.totalorder %s2628_s17, %s3135_s1 }
  0x1b   : > { %p2244_p8 = scmp.ne.s32.totalorder %s2628_s17, %s2243_s22  ;;  %p2250_p13 = scmp.lt.u32.totalorder %s2248_s9, %s2243_s22 }
  0x1c   : > { %p2252_p2 = scmp.lt.u32.totalorder %s2243_s22, %s2628_s17 }
  0x1d   : > { %p2246_p10 = pnand %p2245_p9, %p2244_p8  ;;  %p2251_p0 = por %p2250_p13, %p2249_p12 }
  0x1f   : > { %p2247_p11 = pneg %p2246_p10  ;;  %p2253_p4 = por %p2252_p2, %p2251_p0 }
  0x21   : > { %p2254_p5 = pnand %p2253_p4, %p2247_p11 }
  0x23   : > { %2257 = shalt.err (!%p2254_p5)
}
  0x24   : > { %s2258_s10 = scalar_lea.vmem %s2635_s20, 512  ;;  %s2515_s16 = smov [#allocation6]  }
  0x25   : > { %p2259_p6 = scmp.ne.s32.totalorder %s2635_s20, %s2258_s10  ;;  %s2263_s19 = sshll.u32 %s2515_s16, 4  ;;  %s2264_s19 = int_to_ptr.vmem [resolvable:$false] %s2263_s19 }
  0x26   : > { %s2265_s23 = scalar_lea.vmem %s2264_s19, 1024  ;;  %p2266_p3 = scmp.lt.s32.totalorder %s2635_s20, %s2264_s19 }
  0x27   : > { %p2261_p8 = pnand %p2259_p6, %p2245_p9  ;;  %p2267_p12 = scmp.lt.s32.totalorder %s2265_s23, %s2258_s10 }
  0x29   : > { %p2262_p10 = pneg %p2261_p8  ;;  %p2268_p13 = por %p2267_p12, %p2266_p3 }
  0x2b   : > { %p2269_p0 = pnand %p2268_p13, %p2262_p10 }
  0x2d   : > { %2272 = shalt.err (!%p2269_p0)
}
  0x2e   : > { %s3125_s22 = smov 128   ;;  %s3126_s8 = smov 8  }
  0x2f   : > { %2039 = dma.hbm_to_vmem [thread:$0]  (!%p2630_p7), %s2628_s17, 512, %s2635_s20, %s2637_s21, %s3125_s22, %s3125_s22, %s3126_s8  }
  0x30   : > { %s2673_s15 = scalar_lea.hbm %s3119_s2, %s1784_s12  ;;  %s314_s10 = scalar_lea.vmem [#allocation8], %s2621_s14 }
  0x31   : > { %s321_s16 = sshll.u32 %s314_s10, 4  ;;  %s2679_s19 = sadd.s32 4294967295, %s2481_s29   ;;  %s2676_s16 = int_to_ptr.vmem [resolvable:$true] %s321_s16 }
  0x32   : > { %s1740_s23 = sadd.s32 4294967294, %s2481_s29   ;;  %p86_p3 = scmp.ne.s32.totalorder %s2465_s25, %s2461_s24 }
  0x33   : > { %p3128_p11 = scmp.eq.s32.totalorder %s2679_s19, 0  ;;  %p220_p2 = scmp.eq.s32.totalorder %s2679_s19, 1 }
  0x34   : > { %p226_p4 = scmp.eq.s32.totalorder %s1740_s23, 1  ;;  %p1741_p5 = scmp.ge.s32.totalorder %s2481_s29, 1 }
  0x35   : > { %p2689_p6 = por %p3128_p11, %p86_p3  ;;  %p2696_p8 = por %p220_p2, %p80_p1 }
  0x36   : > { %p2700_p10 = por %p226_p4, %p86_p3  ;;  %p261_p12 = scmp.lt.s32.totalorder %s2481_s29, 3 }
  0x37   : > { %s3137_s12 = scalar_select %p2689_p6, 1, 0 }
  0x38   : > { %s3138_s14 = scalar_select %p2696_p8, 1, 0 }
  0x39   : > { %s3139_s17 = scalar_select %p2700_p10, 1, 0 }
  0x3a   : > { %p2705_p13 = pnand %p1741_p5, %p261_p12  ;;  %s2518_s9 = smov [#allocation3]  }
  0x3b   : > { %s275_s11 = sshll.u32 %s2518_s9, 4  ;;  %s2273_s10 = scalar_lea.hbm %s2673_s15, 512  ;;  %s2709_s11 = int_to_ptr.vmem [resolvable:$true] %s275_s11 }
  0x3c   : > { %s3140_s20 = scalar_select %p2705_p13, 1, 0 }
  0x3d   : > { %p2274_p0 = scmp.ne.s32.totalorder %s2673_s15, %s2273_s10  ;;  %s2278_s8 = scalar_lea.hbm %s3119_s2, 1024 }
  0x3e   : > { %p2279_p4 = scmp.lt.u32.totalorder %s2673_s15, %s3119_s2  ;;  %p2280_p5 = scmp.lt.u32.totalorder %s2278_s8, %s2273_s10 }
  0x3f   : > { %p2276_p3 = pnand %p2274_p0, %p2245_p9  ;;  %p2282_p11 = scmp.lt.u32.totalorder %s2273_s10, %s2673_s15 }
  0x40   : > { %p2281_p12 = por %p2280_p5, %p2279_p4 }
  0x41   : > { %p2277_p2 = pneg %p2276_p3 }
  0x42   : > { %p2283_p10 = por %p2282_p11, %p2281_p12 }
  0x44   : > { %p2284_p8 = pnand %p2283_p10, %p2277_p2 }
  0x46   : > { %2287 = shalt.err (!%p2284_p8)
}
  0x47   : > { %s2288_s9 = scalar_lea.vmem %s2676_s16, 512  ;;  %s2519_s22 = smov [#allocation8]  }
  0x48   : > { %p2289_p0 = scmp.ne.s32.totalorder %s2676_s16, %s2288_s9  ;;  %s2293_s23 = sshll.u32 %s2519_s22, 4  ;;  %s2294_s23 = int_to_ptr.vmem [resolvable:$false] %s2293_s23 }
  0x49   : > { %s2295_s1 = scalar_lea.vmem %s2294_s23, 1024  ;;  %p2296_p6 = scmp.lt.s32.totalorder %s2676_s16, %s2294_s23 }
  0x4a   : > { %p2291_p3 = pnand %p2289_p0, %p2245_p9  ;;  %p2297_p4 = scmp.lt.s32.totalorder %s2295_s1, %s2288_s9 }
  0x4c   : > { %p2292_p1 = pneg %p2291_p3  ;;  %p2298_p5 = por %p2297_p4, %p2296_p6 }
  0x4e   : > { %p2299_p11 = pnand %p2298_p5, %p2292_p1 }
  0x50   : > { %2302 = shalt.err (!%p2299_p11)
}
  0x51   : > { %s3141_s30 = smov 8   ;;  %s3142_s8 = smov 128  }
  0x52   : > { %2042 = dma.hbm_to_vmem [thread:$0]  (!%p2630_p7), %s2673_s15, 512, %s2676_s16, %s2637_s21, %s3142_s8, %s3142_s8, %s3141_s30  }
  0x53   : > { %p3143_p9 = scmp.eq.s32.totalorder %s2679_s19, 0  ;;  %p3144_p8 = pneg %p2705_p13 }
  0x54   : > { %s3146_s0 = sld [smem:[#allocation17_spill]] }
  0x55   : > { %p2745_p10 = pnand %p3144_p8, %p3143_p9 }
  0x57   : > { %p2305_p1 = pneg %p2745_p10 }
  0x5a   : > { %s2303_s18 = scalar_lea.hbm %s3146_s0, 256 }
  0x5b   : > { %p2304_p6 = scmp.ne.s32.totalorder %s3146_s0, %s2303_s18  ;;  %p2310_p12 = scmp.lt.u32.totalorder %s2303_s18, %s3146_s0 }
  0x5d   : > { %p2306_p2 = pnand %p2305_p1, %p2304_p6 }
  0x5f   : > { %p2307_p7 = pneg %p2306_p2 }
  0x61   : > { %p2312_p0 = pnand %p2310_p12, %p2307_p7 }
  0x63   : > { %2315 = shalt.err (!%p2312_p0)
}
  0x64   : > { %s2316_s16 = scalar_lea.vmem %s2709_s11, 256  ;;  %p2324_p11 = scmp.lt.s32.totalorder %s2709_s11, %s2709_s11 }
  0x65   : > { %p2317_p3 = scmp.ne.s32.totalorder %s2709_s11, %s2316_s16  ;;  %p2325_p9 = scmp.lt.s32.totalorder %s2316_s16, %s2316_s16 }
  0x67   : > { %p2319_p4 = pnand %p2317_p3, %p2305_p1  ;;  %p2326_p8 = por %p2325_p9, %p2324_p11 }
  0x69   : > { %p2320_p5 = pneg %p2319_p4 }
  0x6b   : > { %p2327_p13 = pnand %p2326_p8, %p2320_p5 }
  0x6d   : > { %2330 = shalt.err (!%p2327_p13)
}
  0x6e   : > { %s2520_s30 = smov 32   ;;  %s2521_s8 = smov 2  }
  0x6f   : > { %2035 = dma.hbm_to_vmem [thread:$0]  (!%p2745_p10), %s3146_s0, 256, %s2709_s11, [#allocation4], %s2520_s30, %s2520_s30, %s2521_s8  }
  0x70   : > { %p3147_p6 = scmp.ne.s32.totalorder %s3140_s20, 0 }
  0x71   : > { %p3148_p1 = scmp.eq.s32.totalorder (!%p3147_p6), %s2679_s19, 0 }
  0x72   : > { %359 = sbr.rel (%p3147_p6) target bundleno = 6007 (0x1777), region = 44 }
  0x79   : > { %2444 = dma.done.wait (%p3148_p1), [#allocation4], 256   ;;  %p3149_p2 = pmov %p3148_p1 }
  0x7a   : > { %s365_s18 = sand.u32 1, %s2679_s19   ;;  %s2778_s23 = sand.u32 1, %s2465_s25  }
  0x7b   : > { %2446 = vsyncadd (%p3149_p2), [#allocation4], 4294967040  ;;  %s1752_s10 = sshll.u32 %s2778_s23, 5  ;;  %s366_s1 = scalar_lea.sflag [#allocation7], %s365_s18 }
  0x7c   : > { %s2781_s21 = scalar_lea.vmem [#allocation6], %s1752_s10  ;;  %p3150_p13 = scmp.ne.s32.totalorder %s3137_s12, 0 }
  0x7e   : > { %2448 = dma.done.wait (%p3150_p13), %s366_s1, 1024  }
  0x7f   : > { %2450 = vsyncadd (%p3150_p13), %s366_s1, 4294966272  ;;  %p436_p10 = scmp.lt.s32.totalorder %s2473_s27, 1  ;;  %p459_p7 = scmp.eq.s32.totalorder %s2473_s27, 0  ;;  %v463_v8 = vld [vmem:[#allocation3] sm:$0x3] }
  0x80   : > { %s378_s19 = scalar_lea.vmem [#allocation8], %s1752_s10  ;;  %v464_v9 = vld [vmem:[#allocation3 + $0x2] sm:$0x3]  ;;  %v465_v10 = vld [vmem:[#allocation3 + $0x4] sm:$0x3]  ;;  %v490_v24 = vld [vmem:[%s2781_s21] sm:$0xff] (!%p459_p7)  ;;  %v513_v27 = vlaneseq (!%p459_p7) }
  0x81   : > { %s2791_s20 = scalar_select %p436_p10, %s2473_s27, 1  ;;  %v2806_v1 = vld [vmem:[%s378_s19] sm:$0xff]  ;;  %v2808_v2 = vld [vmem:[%s378_s19 + $0x8] sm:$0xff]  ;;  %v2810_v3 = vld [vmem:[%s378_s19 + $0x10] sm:$0xff] }
  0x82   : > { %s1996_s11 = scalar_select %p459_p7, 1, 0  ;;  %v2812_v4 = vld [vmem:[%s378_s19 + $0x18] sm:$0xff]  ;;  %v466_v11 = vld [vmem:[#allocation3 + $0x6] sm:$0x3]  ;;  %v491_v25 = vld [vmem:[%s2781_s21 + $0x8] sm:$0xff] (!%p459_p7) }
  0x83   : > { %s438_s30 = scalar_lea.vmem %s3120_s3, %s2791_s20  ;;  %s1756_s12 = sshll.u32 %s2791_s20, 1  ;;  %v467_v12 = vld [vmem:[#allocation3 + $0x8] sm:$0x3]  ;;  %v468_v13 = vld [vmem:[#allocation3 + $0xa] sm:$0x3]  ;;  %v492_v26 = vld [vmem:[%s2781_s21 + $0x10] sm:$0xff] (!%p459_p7)  ;;  %v1931_v28 = vpack.c.bf16 (!%p459_p7), %v491_v25, %v490_v24 }
  0x84   : > { %s445_s22 = scalar_lea.vmem %s3121_s4, %s1756_s12  ;;  %s452_s0 = scalar_lea.vmem %s3122_s5, %s1756_s12  ;;  %v1997_v0 = vstv %s1996_s11  ;;  %v469_v14 = vld [vmem:[#allocation3 + $0xc] sm:$0x3]  ;;  %v470_v15 = vld [vmem:[#allocation3 + $0xe] sm:$0x3]  ;;  %v482_v30 = vld [vmem:[#allocation2] sm:$0x3] (!%p459_p7) }
  0x85   : > { %v2814_v5 = vld [vmem:[%s445_s22] sm:$0x3]  ;;  %vm2818_vm0 = vcmp.ne.s32.totalorder %v1997_v0, 0  ;;  %481 = sbr.rel (%p459_p7) target bundleno = 368 (0x170), region = 64  ;;  %v493_v29 = vld [vmem:[%s2781_s21 + $0x18] sm:$0xff] (!%p459_p7)  ;;  %v514_v37 = vshrl.u32 (!%p459_p7), %v513_v27, 7  ;;  %1932 = vmatprep.subr.bf16.mxu0 (!%p459_p7), %v1931_v28 }
  0x86   : > { %v2816_v6 = vld [vmem:[%s452_s0] sm:$0x3]  ;;  %v1999_v16 = vsel %vm2818_vm0, %v463_v8, 0   ;;  %v2003_v17 = vsel %vm2818_vm0, %v464_v9, 0   ;;  %v2007_v18 = vsel %vm2818_vm0, %v465_v10, 0   ;;  %v2011_v19 = vsel %vm2818_vm0, %v466_v11, 0   ;;  %1934 = vmatpush3.bf16.msra.mxu0 (!%p459_p7), %v1931_v28 }
  0x87   : > { %v2015_v20 = vsel %vm2818_vm0, %v467_v12, 0   ;;  %v2019_v21 = vsel %vm2818_vm0, %v468_v13, 0   ;;  %v2023_v22 = vsel %vm2818_vm0, %v469_v14, 0   ;;  %v2027_v23 = vsel %vm2818_vm0, %v470_v15, 0   ;;  %s3153_s0 = sshll.u32 %s2778_s23, 1 }
  0x88   : > { %s2840_s10 = scalar_lea.vmem [#allocation9], %s3153_s0  ;;  %s3154_s19 = smov %s3153_s0  ;;  %v483_v31 = vld [vmem:[#allocation2 + $0x2] sm:$0x3] (!%p459_p7)  ;;  %v2522_v32 = vmov (!%p459_p7), 1983009808   ;;  %v1935_v34 = vpack.c.bf16 (!%p459_p7), %v493_v29, %v492_v26  ;;  %vm552_vm1 = vcmask (!%p459_p7), 261120  }
  0x89   : > { %s2844_s11 = scalar_lea.vmem [#allocation10], %s3154_s19  ;;  %v511_v33 = vunpack.c.l.s4 (!%p459_p7), %v2522_v32  ;;  %v484_v35 = vld [vmem:[#allocation2 + $0x4] sm:$0x3] (!%p459_p7)  ;;  %v485_v36 = vld [vmem:[#allocation2 + $0x6] sm:$0x3] (!%p459_p7)  ;;  %v508_v38 = vcombine.low (!%p459_p7), %v482_v30, %v483_v31 }
  0x8a   : > { %v509_v39 = vcombine.low (!%p459_p7), %v484_v35, %v485_v36  ;;  %v486_v41 = vld [vmem:[#allocation2 + $0x8] sm:$0x3] (!%p459_p7)  ;;  %v487_v42 = vld [vmem:[#allocation2 + $0xa] sm:$0x3] (!%p459_p7)  ;;  %v488_v43 = vld [vmem:[#allocation2 + $0xc] sm:$0x3] (!%p459_p7)  ;;  %1936 = vmatprep.subr.bf16.mxu0 (!%p459_p7), %v1935_v34 }
  0x8b   : > { %v512_v40 = vunpack.c.0.s8 (!%p459_p7), %v511_v33  ;;  %v489_v44 = vld [vmem:[#allocation2 + $0xe] sm:$0x3] (!%p459_p7)  ;;  %v525_v45 = vcombine.low (!%p459_p7), %v486_v41, %v487_v42  ;;  %1938 = vmatpush3.bf16.msra.mxu0 (!%p459_p7), %v1935_v34  ;;  %v1759_v54 = vld [vmem:[%s438_s30] ss:$0 sm:$0xff] (!%p459_p7) }
  0x8c   : > { %v526_v47 = vcombine.low %v488_v43, %v489_v44  ;;  %v542_v55 = vcombine.low %v1759_v54, %v1759_v54 }
  0x8d   : > { %v515_v46 = vsub.s32 %v512_v40, %v514_v37 }
  0x8f   : > { %v516_v48 = vrot.slane %v508_v38, %v515_v46  ;;  %v523_v49 = vrot.slane %v509_v39, %v515_v46  ;;  %v533_v50 = vrot.slane %v525_v45, %v515_v46  ;;  %v540_v51 = vrot.slane %v526_v47, %v515_v46 }
  0x90   : > { %v549_v56 = vrot.slane %v542_v55, %v515_v46 }
  0x91   : > { %v524_v52 = vcombine.low %v516_v48, %v523_v49  ;;  %v541_v53 = vcombine.low %v533_v50, %v540_v51 }
  0x92   : > { %v550_v57 = vcombine.low %v549_v56, %v549_v56 }
  0x93   : > { %1840 = vmatprep.mubr.msk.f32.mxu0 %vm552_vm1, %v524_v52 }
  0x94   : > { %1841 = vmatmul.mubr.msk.f32.vlgmr.msra.gmra.mrb[0].mxu0 %vm552_vm1, %v541_v53 }
 0x167   : > { %v1842_v58 = vpop.f32.mrb[0].mxu0 }
 0x168   : > { %v629_v59 = vadd.f32 %v1842_v58, %v550_v57  ;;  %v623_v60 = vpop.f32.mrb[1].mxu0 }
 0x169   : > { %v624_v61 = vadd.f32 %v623_v60, %v550_v57 }
 0x16a   : > { %v651_v62 = vcombine.high %v629_v59, %v629_v59  ;;  %v658_v20 = vrot.slane %v629_v59, %v515_v46  }
 0x16b   : > { %v634_v63 = vcombine.high %v624_v61, %v624_v61  ;;  %v641_v16 = vrot.slane %v624_v61, %v515_v46  }
 0x16c   : > { %v665_v22 = vrot.slane %v651_v62, %v515_v46   ;;  %v666_v21 = vcombine.high %v658_v20, %v658_v20  }
 0x16d   : > { %v648_v18 = vrot.slane %v634_v63, %v515_v46   ;;  %v649_v17 = vcombine.high %v641_v16, %v641_v16  }
 0x16e   : > { %v667_v23 = vcombine.high %v665_v22, %v665_v22  }
 0x16f   : > { %v650_v19 = vcombine.high %v648_v18, %v648_v18  }
 0x170 PF: > { %v2913_v0 = vpack.c.bf16 %v2808_v2, %v2806_v1  ;;  %v2523_v7 = vmov 0.0|0.0   ;;  %v2920_v8 = vpack.c.bf16 %v2812_v4, %v2810_v3  ;;  %vm2524_vm2 = vmmov 0   ;;  %s2526_s20 = smov 32   ;;  %s2527_s16 = smov 64   ;;  %v2513_v16 = vphi %v1999_v16, %v641_v16   ;;  %v2509_v17 = vphi %v2003_v17, %v649_v17   ;;  %v2505_v18 = vphi %v2007_v18, %v648_v18   ;;  %v2501_v19 = vphi %v2011_v19, %v650_v19   ;;  %v2497_v20 = vphi %v2015_v20, %v658_v20   ;;  %v2493_v21 = vphi %v2019_v21, %v666_v21   ;;  %v2489_v22 = vphi %v2023_v22, %v665_v22   ;;  %v2485_v23 = vphi %v2027_v23, %v667_v23  }
 0x171   : > { %1939 = vmatprep.subr.bf16.mxu0 %v2523_v7  ;;  %1945 = vmatprep.subr.bf16.mxu1 %v2523_v7  ;;  %v2525_v9 = vmov 0.0   ;;  %vm684_vm3 = vcmask 261120   ;;  %vm791_vm4 = vcmask 254976   ;;  %s2528_s30 = smov 96   ;;  %s1780_s12 = sshll.u32 %s2473_s27, 5 }
 0x172   : > { %1941 = vmatpush3.bf16.msra.mxu0 %v2913_v0  ;;  %1851 = vmatprep.mubr.msk.f32.mxu0 %vm2524_vm2, %v2525_v9  ;;  %s1554_s8 = sshll.u32 %s2844_s11, 4  ;;  %s3031_s18 = scalar_lea.hbm %s3124_s7, %s1780_s12  ;;  %s3033_s8 = int_to_ptr.vmem [resolvable:$true] %s1554_s8 }
 0x173   : > { %1942 = vmatprep.subr.bf16.mxu0 %v2523_v7  ;;  %1947 = vmatpush3.bf16.msra.mxu1 %v2913_v0  ;;  %s1526_s1 = scalar_lea.sflag [#allocation11], %s2778_s23  ;;  %s2331_s0 = scalar_lea.vmem %s3033_s8, 32 }
 0x174   : > { %1948 = vmatprep.subr.bf16.mxu1 %v2523_v7  ;;  %1862 = vmatprep.mubr.msk.f32.mxu1 %vm2524_vm2, %v2525_v9  ;;  %p2332_p12 = scmp.ne.s32.totalorder %s3033_s8, %s2331_s0  ;;  %p3155_p0 = scmp.ne.s32.totalorder %s3138_s14, 0 }
 0x175   : > { %s2529_s19 = smov [#allocation10]  }
 0x176   : > { %1944 = vmatpush3.bf16.msra.mxu0 %v2920_v8  ;;  %p2333_p3 = pnand %p2332_p12, %p3155_p0  ;;  %s2335_s21 = sshll.u32 %s2529_s19, 4  ;;  %s2336_s21 = int_to_ptr.vmem [resolvable:$false] %s2335_s21 }
 0x177   : > { %1950 = vmatpush3.bf16.msra.mxu1 %v2920_v8  ;;  %1951 = vmatprep.subr.bf16.mxu0 %v2523_v7  ;;  %s2337_s15 = scalar_lea.vmem %s2336_s21, 64  ;;  %p2338_p5 = scmp.lt.s32.totalorder %s3033_s8, %s2336_s21 }
 0x178   : > { %1957 = vmatprep.subr.bf16.mxu1 %v2523_v7  ;;  %p2334_p4 = pneg %p2333_p3  ;;  %p2339_p11 = scmp.lt.s32.totalorder %s2337_s15, %s2331_s0 }
 0x179   : > { %1852 = vmatmul.mubr.msk.f32.vlgmr.msra.gmra.mrb[0].mxu0 %vm684_vm3, %v2814_v5 }
 0x17a   : > { %1953 = vmatpush3.bf16.msra.mxu0 %v2913_v0  ;;  %1873 = vmatprep.mubr.msk.f32.mxu0 %vm2524_vm2, %v2525_v9  ;;  %p2340_p9 = por %p2339_p11, %p2338_p5 }
 0x17b   : > { %1954 = vmatprep.subr.bf16.mxu0 %v2523_v7 }
 0x17c   : > { %p2341_p8 = pnand %p2340_p9, %p2334_p4 }
 0x17e   : > { %1956 = vmatpush3.bf16.msra.mxu0 %v2920_v8 }
 0x17f   : > { %1963 = vmatprep.subr.bf16.mxu0 %v2523_v7 }
 0x24c   : > { %v754_v1 = vpop.f32.mrb[0].mxu0 }
 0x24d   : > { %v758_v2 = vadd.f32 %v2513_v16, %v754_v1  ;;  %v1853_v3 = vpop.f32.mrb[1].mxu0 }
 0x24f   : > { %2179 = vtanh.f32 %v758_v2  ;;  %v1763_v5 = vmul.f32 -1.442695, %v758_v2 }
 0x251   : > { %2181 = vpow2.f32 %v1763_v5 }
 0x259   : > { %v2180_v4 = vpop.eup %2179 }
 0x25a   : > { %772 = vrot.lane.b32.xlu0 %v2180_v4, %s2526_s20 }
 0x25b   : > { %v2182_v10 = vpop.eup %2181 }
 0x25c   : > { %v762_v11 = vadd.f32 1.0, %v2182_v10 }
 0x25e   : > { %767 = vrot.lane.b32.xlu0 %v2816_v6, %s2526_s20  ;;  %2183 = vrcp.f32 %v762_v11 }
 0x268   : > { %v2184_v12 = vpop.eup %2183 }
 0x2cc   : > { %v773_v13 = vpop.permute.xlu0 %772 }
 0x2cd   : > { %v775_v14 = vmul.f32 %v2184_v12, %v773_v13 }
 0x2cf   : > { %777 = vrot.lane.b32.xlu1 %v775_v14, %s2526_s20 }
 0x2d0   : > { %v768_v15 = vpop.permute.xlu0 %767 }
 0x2d1   : > { %v770_v16 = vmul.f32 %v2184_v12, %v768_v15 }
 0x341   : > { %v778_v24 = vpop.permute.xlu1 %777 }
 0x342   : > { %v780_v25 = vadd.f32 %v778_v24, %v770_v16 }
 0x344   : > { %2185 = vtanh.f32 %v780_v25 }
 0x34e   : > { %v2186_v26 = vpop.eup %2185 }
 0x34f   : > { %783 = vrot.lane.b32.xlu1 %v2186_v26, %s2526_s20 }
 0x3c1   : > { %v784_v27 = vpop.permute.xlu1 %783 }
 0x3c2   : > { %v786_v6 = vmul.f32 %v2184_v12, %v784_v27 }
 0x3c4   : > { %788 = vrot.lane.b32.xlu0 %v786_v6, %s2527_s16 }
 0x436   : > { %v789_v28 = vpop.permute.xlu0 %788 }
 0x437   : > { %792 = vst.msk [vmem:[#allocation2] sm:$0x3] %vm791_vm4, %v789_v28  ;;  %1863 = vmatmul.mubr.msk.f32.vlgmr.msra.gmra.mrb[0].mxu1 %vm684_vm3, %v789_v28 }
 0x438   : > { %1959 = vmatpush3.bf16.msra.mxu1 %v2913_v0  ;;  %1884 = vmatprep.mubr.msk.f32.mxu1 %vm2524_vm2, %v2525_v9 }
 0x439   : > { %1960 = vmatprep.subr.bf16.mxu1 %v2523_v7 }
 0x43c   : > { %1962 = vmatpush3.bf16.msra.mxu1 %v2920_v8 }
 0x43d   : > { %1969 = vmatprep.subr.bf16.mxu1 %v2523_v7 }
 0x50a   : > { %v861_v29 = vpop.f32.mrb[0].mxu1 }
 0x50b   : > { %v865_v30 = vadd.f32 %v2509_v17, %v861_v29  ;;  %v1864_v31 = vpop.f32.mrb[1].mxu1 }
 0x50d   : > { %2187 = vtanh.f32 %v865_v30  ;;  %v1765_v33 = vmul.f32 -1.442695, %v865_v30 }
 0x50f   : > { %2189 = vpow2.f32 %v1765_v33 }
 0x517   : > { %v2188_v32 = vpop.eup %2187 }
 0x518   : > { %875 = vrot.lane.b32.xlu1 %v2188_v32, %s2526_s20 }
 0x519   : > { %v2190_v34 = vpop.eup %2189 }
 0x51a   : > { %v869_v35 = vadd.f32 1.0, %v2190_v34 }
 0x51c   : > { %2191 = vrcp.f32 %v869_v35 }
 0x526   : > { %v2192_v36 = vpop.eup %2191 }
 0x527   : > { %v873_v39 = vmul.f32 %v2192_v36, %v780_v25 }
 0x58a   : > { %v876_v37 = vpop.permute.xlu1 %875 }
 0x58b   : > { %v878_v38 = vmul.f32 %v2192_v36, %v876_v37 }
 0x58d   : > { %880 = vrot.lane.b32.xlu0 %v878_v38, %s2526_s20 }
 0x5ff   : > { %v881_v40 = vpop.permute.xlu0 %880 }
 0x600   : > { %v883_v41 = vadd.f32 %v881_v40, %v873_v39 }
 0x602   : > { %2193 = vtanh.f32 %v883_v41 }
 0x60c   : > { %v2194_v17 = vpop.eup %2193 }
 0x60d   : > { %886 = vrot.lane.b32.xlu1 %v2194_v17, %s2526_s20 }
 0x67f   : > { %v887_v42 = vpop.permute.xlu1 %886 }
 0x680   : > { %v889_v43 = vmul.f32 %v2192_v36, %v887_v42 }
 0x682   : > { %891 = vrot.lane.b32.xlu0 %v889_v43, %s2527_s16 }
 0x6f4   : > { %v892_v44 = vpop.permute.xlu0 %891 }
 0x6f5   : > { %895 = vst.msk [vmem:[#allocation2 + $0x2] sm:$0x3] %vm791_vm4, %v892_v44  ;;  %1874 = vmatmul.mubr.msk.f32.vlgmr.msra.gmra.mrb[2].mxu0 %vm684_vm3, %v892_v44 }
 0x6f6   : > { %1965 = vmatpush3.bf16.msra.mxu0 %v2913_v0  ;;  %1895 = vmatprep.mubr.msk.f32.mxu0 %vm2524_vm2, %v2525_v9 }
 0x6f7   : > { %1966 = vmatprep.subr.bf16.mxu0 %v2523_v7 }
 0x6fa   : > { %1968 = vmatpush3.bf16.msra.mxu0 %v2920_v8 }
 0x6fb   : > { %1975 = vmatprep.subr.bf16.mxu0 %v2523_v7 }
 0x7c8   : > { %v964_v45 = vpop.f32.mrb[2].mxu0 }
 0x7c9   : > { %v968_v46 = vadd.f32 %v2505_v18, %v964_v45  ;;  %v1875_v47 = vpop.f32.mrb[3].mxu0 }
 0x7cb   : > { %2195 = vtanh.f32 %v968_v46  ;;  %v1767_v49 = vmul.f32 -1.442695, %v968_v46 }
 0x7cd   : > { %2197 = vpow2.f32 %v1767_v49 }
 0x7d5   : > { %v2196_v48 = vpop.eup %2195 }
 0x7d6   : > { %978 = vrot.lane.b32.xlu1 %v2196_v48, %s2526_s20 }
 0x7d7   : > { %v2198_v50 = vpop.eup %2197 }
 0x7d8   : > { %v972_v51 = vadd.f32 1.0, %v2198_v50 }
 0x7da   : > { %2199 = vrcp.f32 %v972_v51 }
 0x7e4   : > { %v2200_v52 = vpop.eup %2199 }
 0x7e5   : > { %v976_v55 = vmul.f32 %v2200_v52, %v883_v41 }
 0x848   : > { %v979_v53 = vpop.permute.xlu1 %978 }
 0x849   : > { %v981_v54 = vmul.f32 %v2200_v52, %v979_v53 }
 0x84b   : > { %983 = vrot.lane.b32.xlu0 %v981_v54, %s2526_s20 }
 0x8bd   : > { %v984_v56 = vpop.permute.xlu0 %983 }
 0x8be   : > { %v986_v57 = vadd.f32 %v984_v56, %v976_v55 }
 0x8c0   : > { %2201 = vtanh.f32 %v986_v57 }
 0x8ca   : > { %v2202_v18 = vpop.eup %2201 }
 0x8cb   : > { %989 = vrot.lane.b32.xlu1 %v2202_v18, %s2526_s20 }
 0x93d   : > { %v990_v58 = vpop.permute.xlu1 %989 }
 0x93e   : > { %v992_v59 = vmul.f32 %v2200_v52, %v990_v58 }
 0x940   : > { %994 = vrot.lane.b32.xlu0 %v992_v59, %s2527_s16 }
 0x9b2   : > { %v995_v60 = vpop.permute.xlu0 %994 }
 0x9b3   : > { %998 = vst.msk [vmem:[#allocation2 + $0x4] sm:$0x3] %vm791_vm4, %v995_v60  ;;  %1885 = vmatmul.mubr.msk.f32.vlgmr.msra.gmra.mrb[2].mxu1 %vm684_vm3, %v995_v60 }
 0x9b4   : > { %1971 = vmatpush3.bf16.msra.mxu1 %v2913_v0  ;;  %1906 = vmatprep.mubr.msk.f32.mxu1 %vm2524_vm2, %v2525_v9 }
 0x9b5   : > { %1972 = vmatprep.subr.bf16.mxu1 %v2523_v7 }
 0x9b8   : > { %1974 = vmatpush3.bf16.msra.mxu1 %v2920_v8 }
 0x9b9   : > { %1981 = vmatprep.subr.bf16.mxu1 %v2523_v7 }
 0xa86   : > { %v1067_v61 = vpop.f32.mrb[2].mxu1 }
 0xa87   : > { %v1071_v62 = vadd.f32 %v2501_v19, %v1067_v61  ;;  %v1886_v63 = vpop.f32.mrb[3].mxu1 }
 0xa89   : > { %2203 = vtanh.f32 %v1071_v62  ;;  %v1769_v2 = vmul.f32 -1.442695, %v1071_v62 }
 0xa8b   : > { %2205 = vpow2.f32 %v1769_v2 }
 0xa93   : > { %v2204_v1 = vpop.eup %2203 }
 0xa94   : > { %1081 = vrot.lane.b32.xlu1 %v2204_v1, %s2526_s20 }
 0xa95   : > { %v2206_v3 = vpop.eup %2205 }
 0xa96   : > { %v1075_v4 = vadd.f32 1.0, %v2206_v3 }
 0xa98   : > { %2207 = vrcp.f32 %v1075_v4 }
 0xaa2   : > { %v2208_v5 = vpop.eup %2207 }
 0xaa3   : > { %v1079_v12 = vmul.f32 %v2208_v5, %v986_v57 }
 0xb06   : > { %v1082_v10 = vpop.permute.xlu1 %1081 }
 0xb07   : > { %v1084_v11 = vmul.f32 %v2208_v5, %v1082_v10 }
 0xb09   : > { %1086 = vrot.lane.b32.xlu0 %v1084_v11, %s2526_s20 }
 0xb7b   : > { %v1087_v13 = vpop.permute.xlu0 %1086 }
 0xb7c   : > { %v1089_v14 = vadd.f32 %v1087_v13, %v1079_v12 }
 0xb7e   : > { %2209 = vtanh.f32 %v1089_v14 }
 0xb88   : > { %v2210_v19 = vpop.eup %2209 }
 0xb89   : > { %1092 = vrot.lane.b32.xlu1 %v2210_v19, %s2526_s20 }
 0xbfb   : > { %v1093_v15 = vpop.permute.xlu1 %1092 }
 0xbfc   : > { %v1095_v16 = vmul.f32 %v2208_v5, %v1093_v15 }
 0xbfe   : > { %1097 = vrot.lane.b32.xlu0 %v1095_v16, %s2527_s16 }
 0xc70   : > { %v1098_v24 = vpop.permute.xlu0 %1097 }
 0xc71   : > { %1101 = vst.msk [vmem:[#allocation2 + $0x6] sm:$0x3] %vm791_vm4, %v1098_v24  ;;  %1896 = vmatmul.mubr.msk.f32.vlgmr.msra.gmra.mrb[4].mxu0 %vm684_vm3, %v1098_v24 }
 0xc72   : > { %1977 = vmatpush3.bf16.msra.mxu0 %v2913_v0  ;;  %1917 = vmatprep.mubr.msk.f32.mxu0 %vm2524_vm2, %v2525_v9 }
 0xc73   : > { %1978 = vmatprep.subr.bf16.mxu0 %v2523_v7 }
 0xc76   : > { %1980 = vmatpush3.bf16.msra.mxu0 %v2920_v8 }
 0xd44   : > { %v1170_v25 = vpop.f32.mrb[4].mxu0 }
 0xd45   : > { %v1174_v26 = vadd.f32 %v2497_v20, %v1170_v25  ;;  %v1897_v27 = vpop.f32.mrb[5].mxu0 }
 0xd47   : > { %2211 = vtanh.f32 %v1174_v26  ;;  %v1771_v28 = vmul.f32 -1.442695, %v1174_v26 }
 0xd49   : > { %2213 = vpow2.f32 %v1771_v28 }
 0xd51   : > { %v2212_v6 = vpop.eup %2211 }
 0xd52   : > { %1184 = vrot.lane.b32.xlu1 %v2212_v6, %s2526_s20 }
 0xd53   : > { %v2214_v29 = vpop.eup %2213 }
 0xd54   : > { %v1178_v30 = vadd.f32 1.0, %v2214_v29 }
 0xd56   : > { %2215 = vrcp.f32 %v1178_v30 }
 0xd60   : > { %v2216_v31 = vpop.eup %2215 }
 0xd61   : > { %v1182_v34 = vmul.f32 %v2216_v31, %v1089_v14 }
 0xdc4   : > { %v1185_v32 = vpop.permute.xlu1 %1184 }
 0xdc5   : > { %v1187_v33 = vmul.f32 %v2216_v31, %v1185_v32 }
 0xdc7   : > { %1189 = vrot.lane.b32.xlu0 %v1187_v33, %s2526_s20 }
 0xe39   : > { %v1190_v35 = vpop.permute.xlu0 %1189 }
 0xe3a   : > { %v1192_v36 = vadd.f32 %v1190_v35, %v1182_v34 }
 0xe3c   : > { %2217 = vtanh.f32 %v1192_v36 }
 0xe46   : > { %v2218_v20 = vpop.eup %2217 }
 0xe47   : > { %1195 = vrot.lane.b32.xlu1 %v2218_v20, %s2526_s20 }
 0xeb9   : > { %v1196_v37 = vpop.permute.xlu1 %1195 }
 0xeba   : > { %v1198_v38 = vmul.f32 %v2216_v31, %v1196_v37 }
 0xebc   : > { %1200 = vrot.lane.b32.xlu0 %v1198_v38, %s2527_s16 }
 0xf2e   : > { %v1201_v39 = vpop.permute.xlu0 %1200 }
 0xf2f   : > { %1204 = vst.msk [vmem:[#allocation2 + $0x8] sm:$0x3] %vm791_vm4, %v1201_v39  ;;  %1907 = vmatmul.mubr.msk.f32.vlgmr.msra.gmra.mrb[4].mxu1 %vm684_vm3, %v1201_v39 }
 0xf30   : > { %1983 = vmatpush3.bf16.msra.mxu1 %v2913_v0  ;;  %1928 = vmatprep.mubr.msk.f32.mxu1 %vm2524_vm2, %v2525_v9 }
 0xf31   : > { %1984 = vmatprep.subr.bf16.mxu1 %v2523_v7 }
 0xf34   : > { %1986 = vmatpush3.bf16.msra.mxu1 %v2920_v8 }
0x1002   : > { %v1273_v40 = vpop.f32.mrb[4].mxu1 }
0x1003   : > { %v1277_v41 = vadd.f32 %v2493_v21, %v1273_v40  ;;  %v1908_v17 = vpop.f32.mrb[5].mxu1 }
0x1005   : > { %2219 = vtanh.f32 %v1277_v41  ;;  %v1773_v43 = vmul.f32 -1.442695, %v1277_v41 }
0x1007   : > { %2221 = vpow2.f32 %v1773_v43 }
0x100f   : > { %v2220_v42 = vpop.eup %2219 }
0x1010   : > { %1287 = vrot.lane.b32.xlu1 %v2220_v42, %s2526_s20 }
0x1011   : > { %v2222_v44 = vpop.eup %2221 }
0x1012   : > { %v1281_v45 = vadd.f32 1.0, %v2222_v44 }
0x1014   : > { %2223 = vrcp.f32 %v1281_v45 }
0x101e   : > { %v2224_v0 = vpop.eup %2223 }
0x101f   : > { %v1285_v7 = vmul.f32 %v2224_v0, %v1192_v36 }
0x1082   : > { %v1288_v46 = vpop.permute.xlu1 %1287 }
0x1083   : > { %v1290_v9 = vmul.f32 %v2224_v0, %v1288_v46 }
0x1085   : > { %1292 = vrot.lane.b32.xlu0 %v1290_v9, %s2526_s20 }
0x10f7   : > { %v1293_v8 = vpop.permute.xlu0 %1292 }
0x10f8   : > { %v1295_v47 = vadd.f32 %v1293_v8, %v1285_v7 }
0x10fa   : > { %2225 = vtanh.f32 %v1295_v47 }
0x1104   : > { %v2226_v21 = vpop.eup %2225 }
0x1105   : > { %1298 = vrot.lane.b32.xlu1 %v2226_v21, %s2526_s20 }
0x1177   : > { %v1299_v48 = vpop.permute.xlu1 %1298 }
0x1178   : > { %v1301_v49 = vmul.f32 %v2224_v0, %v1299_v48 }
0x117a   : > { %1303 = vrot.lane.b32.xlu0 %v1301_v49, %s2527_s16 }
0x11ec   : > { %v1304_v50 = vpop.permute.xlu0 %1303 }
0x11ed   : > { %1307 = vst.msk [vmem:[#allocation2 + $0xa] sm:$0x3] %vm791_vm4, %v1304_v50  ;;  %1918 = vmatmul.mubr.msk.f32.vlgmr.msra.gmra.mrb[6].mxu0 %vm684_vm3, %v1304_v50 }
0x12c0   : > { %v1376_v51 = vpop.f32.mrb[6].mxu0 }
0x12c1   : > { %v1380_v52 = vadd.f32 %v2489_v22, %v1376_v51  ;;  %v1919_v53 = vpop.f32.mrb[7].mxu0 }
0x12c3   : > { %2227 = vtanh.f32 %v1380_v52  ;;  %v1775_v55 = vmul.f32 -1.442695, %v1380_v52 }
0x12c5   : > { %2229 = vpow2.f32 %v1775_v55 }
0x12cd   : > { %v2228_v54 = vpop.eup %2227 }
0x12ce   : > { %1390 = vrot.lane.b32.xlu1 %v2228_v54, %s2526_s20 }
0x12cf   : > { %v2230_v56 = vpop.eup %2229 }
0x12d0   : > { %v1384_v57 = vadd.f32 1.0, %v2230_v56 }
0x12d2   : > { %2231 = vrcp.f32 %v1384_v57 }
0x12dc   : > { %v2232_v18 = vpop.eup %2231 }
0x12dd   : > { %v1388_v60 = vmul.f32 %v2232_v18, %v1295_v47 }
0x1340   : > { %v1391_v58 = vpop.permute.xlu1 %1390 }
0x1341   : > { %v1393_v59 = vmul.f32 %v2232_v18, %v1391_v58 }
0x1343   : > { %1395 = vrot.lane.b32.xlu0 %v1393_v59, %s2526_s20 }
0x13b5   : > { %v1396_v61 = vpop.permute.xlu0 %1395 }
0x13b6   : > { %v1398_v62 = vadd.f32 %v1396_v61, %v1388_v60 }
0x13b8   : > { %2233 = vtanh.f32 %v1398_v62 }
0x13c2   : > { %v2234_v22 = vpop.eup %2233 }
0x13c3   : > { %1401 = vrot.lane.b32.xlu1 %v2234_v22, %s2526_s20 }
0x1435   : > { %v1402_v63 = vpop.permute.xlu1 %1401 }
0x1436   : > { %v1404_v1 = vmul.f32 %v2232_v18, %v1402_v63 }
0x1438   : > { %1406 = vrot.lane.b32.xlu0 %v1404_v1, %s2527_s16 }
0x14aa   : > { %v1407_v2 = vpop.permute.xlu0 %1406 }
0x14ab   : > { %1410 = vst.msk [vmem:[#allocation2 + $0xc] sm:$0x3] %vm791_vm4, %v1407_v2  ;;  %1929 = vmatmul.mubr.msk.f32.vlgmr.msra.gmra.mrb[6].mxu1 %vm684_vm3, %v1407_v2 }
0x157e   : > { %v1479_v3 = vpop.f32.mrb[6].mxu1 }
0x157f   : > { %v1483_v4 = vadd.f32 %v2485_v23, %v1479_v3  ;;  %v1930_v5 = vpop.f32.mrb[7].mxu1 }
0x1581   : > { %2235 = vtanh.f32 %v1483_v4  ;;  %v1777_v11 = vmul.f32 -1.442695, %v1483_v4 }
0x1583   : > { %2237 = vpow2.f32 %v1777_v11 }
0x158b   : > { %v2236_v10 = vpop.eup %2235 }
0x158c   : > { %1493 = vrot.lane.b32.xlu1 %v2236_v10, %s2526_s20 }
0x158d   : > { %v2238_v12 = vpop.eup %2237 }
0x158e   : > { %v1487_v13 = vadd.f32 1.0, %v2238_v12 }
0x1590   : > { %2239 = vrcp.f32 %v1487_v13 }
0x159a   : > { %v2240_v14 = vpop.eup %2239 }
0x159b   : > { %v1491_v16 = vmul.f32 %v2240_v14, %v1398_v62 }
0x15fe   : > { %v1494_v19 = vpop.permute.xlu1 %1493 }
0x15ff   : > { %v1496_v15 = vmul.f32 %v2240_v14, %v1494_v19 }
0x1601   : > { %1498 = vrot.lane.b32.xlu0 %v1496_v15, %s2526_s20 }
0x1673   : > { %v1499_v23 = vpop.permute.xlu0 %1498 }
0x1674   : > { %v1501_v24 = vadd.f32 %v1499_v23, %v1491_v16 }
0x1676   : > { %2241 = vtanh.f32 %v1501_v24 }
0x1680   : > { %v2242_v25 = vpop.eup %2241 }
0x1681   : > { %1504 = vrot.lane.b32.xlu1 %v2242_v25, %s2526_s20 }
0x1685   : > { %1516 = vrot.lane.b32.xlu1 %v1501_v24, %s2528_s30 }
0x16f3   : > { %v1505_v26 = vpop.permute.xlu1 %1504 }
0x16f4   : > { %v1507_v27 = vmul.f32 %v2240_v14, %v1505_v26 }
0x16f6   : > { %1509 = vrot.lane.b32.xlu0 %v1507_v27, %s2527_s16 }
0x16f7   : > { %v1517_v6 = vpop.permute.xlu1 %1516 }
0x16f8   : > { %1519 = vst.msk [vmem:[%s2844_s11] sm:$0x3] %vm791_vm4, %v1517_v6 }
0x16f9   : > { %2344 = shalt.err (!%p2341_p8)
}
0x16fa   : > { %s2345_s11 = scalar_lea.hbm %s3031_s18, 32  ;;  %s2349_s30 = scalar_lea.hbm %s3124_s7, 64 }
0x16fb   : > { %p2346_p6 = scmp.ne.s32.totalorder %s3031_s18, %s2345_s11  ;;  %p2350_p13 = scmp.lt.u32.totalorder %s3031_s18, %s3124_s7 }
0x16fc   : > { %p2351_p10 = scmp.lt.u32.totalorder %s2349_s30, %s2345_s11  ;;  %p2353_p12 = scmp.lt.u32.totalorder %s2345_s11, %s3031_s18 }
0x16fd   : > { %p2347_p1 = pnand %p2346_p6, %p3155_p0 }
0x16fe   : > { %p2352_p7 = por %p2351_p10, %p2350_p13 }
0x16ff   : > { %p2348_p2 = pneg %p2347_p1 }
0x1700   : > { %p2354_p3 = por %p2353_p12, %p2352_p7 }
0x1702   : > { %p2355_p4 = pnand %p2354_p3, %p2348_p2 }
0x1704   : > { %2358 = shalt.err (!%p2355_p4)
}
0x1705   : > { %2029 = dma.vmem_to_hbm [thread:$0]  (%p3155_p0), %s3033_s8, 32, %s3031_s18, %s1526_s1  }
0x1706   : > { %s1540_s0 = sshll.u32 %s2840_s10, 4  ;;  %s3065_s15 = scalar_lea.hbm %s3123_s6, %s1780_s12  ;;  %s3067_s0 = int_to_ptr.vmem [resolvable:$true] %s1540_s0 }
0x1707   : > { %s1521_s11 = scalar_lea.sflag [#allocation5], %s2778_s23  ;;  %s2359_s20 = scalar_lea.vmem %s3067_s0, 32 }
0x1708   : > { %p2360_p5 = scmp.ne.s32.totalorder %s3067_s0, %s2359_s20  ;;  %s2530_s27 = smov [#allocation9]  }
0x1709   : > { %s2363_s8 = sshll.u32 %s2530_s27, 4  ;;  %s2364_s8 = int_to_ptr.vmem [resolvable:$false] %s2363_s8 }
0x170a   : > { %p2361_p11 = pnand %p2360_p5, %p3155_p0  ;;  %s2365_s12 = scalar_lea.vmem %s2364_s8, 64 }
0x170b   : > { %p2366_p8 = scmp.lt.s32.totalorder %s3067_s0, %s2364_s8  ;;  %p2367_p6 = scmp.lt.s32.totalorder %s2365_s12, %s2359_s20 }
0x170c   : > { %p2362_p9 = pneg %p2361_p11 }
0x170d   : > { %p2368_p1 = por %p2367_p6, %p2366_p8 }
0x170f   : > { %p2369_p2 = pnand %p2368_p1, %p2362_p9 }
0x1768   : > { %v1510_v28 = vpop.permute.xlu0 %1509 }
0x1769   : > { %1513 = vst.msk [vmem:[#allocation2 + $0xe] sm:$0x3] %vm791_vm4, %v1510_v28  ;;  %1514 = vst.msk [vmem:[%s2840_s10] sm:$0x3] %vm791_vm4, %v1510_v28 }
0x176a   : > { %2372 = shalt.err (!%p2369_p2)
}
0x176b   : > { %s2373_s23 = scalar_lea.hbm %s3065_s15, 32  ;;  %s2377_s1 = scalar_lea.hbm %s3123_s6, 64 }
0x176c   : > { %p2374_p13 = scmp.ne.s32.totalorder %s3065_s15, %s2373_s23  ;;  %p2378_p12 = scmp.lt.u32.totalorder %s3065_s15, %s3123_s6 }
0x176d   : > { %p2379_p3 = scmp.lt.u32.totalorder %s2377_s1, %s2373_s23  ;;  %p2381_p5 = scmp.lt.u32.totalorder %s2373_s23, %s3065_s15 }
0x176e   : > { %p2375_p10 = pnand %p2374_p13, %p3155_p0 }
0x176f   : > { %p2380_p4 = por %p2379_p3, %p2378_p12 }
0x1770   : > { %p2376_p7 = pneg %p2375_p10 }
0x1771   : > { %p2382_p11 = por %p2381_p5, %p2380_p4 }
0x1773   : > { %p2383_p9 = pnand %p2382_p11, %p2376_p7 }
0x1775   : > { %2386 = shalt.err (!%p2383_p9)
}
0x1776   : > { %2028 = dma.vmem_to_hbm [thread:$0]  (%p3155_p0), %s3067_s0, 32, %s3065_s15, %s1521_s11  }
0x1777 PF: > { %s1566_s9 = sand.u32 1, %s2461_s24   ;;  %p3156_p8 = scmp.ne.s32.totalorder %s3139_s17, 0 }
0x1778   : > { %p3157_p6 = scmp.ge.s32.totalorder %s2481_s29, 2  ;;  %s1567_s22 = scalar_lea.sflag [#allocation5], %s1566_s9 }
0x177a   : > { %p2044_p1 = pnand %p3157_p6, %p3156_p8 }
0x177c   : > { %2452 = dma.done.wait (!%p2044_p1), %s1567_s22, 32  }
0x177d   : > { %2454 = vsyncadd (!%p2044_p1), %s1567_s22, 4294967264  ;;  %s1576_s19 = scalar_lea.sflag [#allocation11], %s1566_s9 }
0x177e   : > { %2456 = dma.done.wait (!%p2044_p1), %s1576_s19, 32  }
0x177f   : > { %2458 = vsyncadd (!%p2044_p1), %s1576_s19, 4294967264  ;;  %s28_s29 = sadd.s32 1, %s2481_s29   ;;  %s3158_s14 = sld [smem:[#allocation16_spill]] }
0x1780   : > { %p25_p2 = scmp.ge.s32.totalorder %s28_s29, 4   ;;  %s3159_s24 = smov %s2465_s25 }
0x1781   : > { %s3160_s25 = smov %s2469_s26  ;;  %s3161_s26 = smov %s2619_s13 }
0x1782   : > { %s3162_s27 = smov %s2477_s28  ;;  %27 = sbr.rel (!%p25_p2) target bundleno = 12 (0xc), region = 147 }
0x1785   : > { %s3163_s28 = smov %s3158_s14 }
0x1789   :  { %1581 = vsyncpa [#allocation4], 1 }
0x178a   :  { %1583 = vsyncpa [#allocation4 + $0x1], 1 }
0x178b   :  { %1584 = vsyncpa [#allocation7], 1 }
0x178c   :  { %1586 = vsyncpa [#allocation7 + $0x1], 1 }
0x178d   :  { %1587 = vsyncpa [#allocation5], 1 }
0x178e   :  { %1589 = vsyncpa [#allocation5 + $0x1], 1 }
0x178f   :  { %1590 = vsyncpa [#allocation11], 1 }
0x1790   :  { %1592 = vsyncpa [#allocation11 + $0x1], 1 }

</bundles_post_ra>
